<compile_context>
chip_gen: v5e
topology: v5e:2x2
jax: 0.10.0
libtpu: 0.0.40
codegen_flags: <defaults>
</compile_context>

<pallas_src>
import math

import jax
import jax.numpy as jnp
from jax.experimental import pallas as pl
from jax.experimental.pallas import tpu as pltpu


def make_mha_forward(embd_dim, num_head, seq_len, batch_block=8):
    """Returns forward(raw_query, raw_keys, raw_values, params) -> (B, E)."""
    assert embd_dim % num_head == 0
    E, H, S, TB = embd_dim, num_head, seq_len, batch_block
    d_k = E // H
    scale = 1.0 / math.sqrt(d_k)

    # ---- head-grouping selectors (exact 0/1 in bf16; built ONCE, outside the grid) ----
    head_of_lane = jnp.arange(E, dtype=jnp.int32) // d_k
    head_ids = jnp.arange(H, dtype=jnp.int32)
    sel_eh = (head_of_lane[:, None] == head_ids[None, :]).astype(jnp.bfloat16)  # (E, H)
    sel_he = (head_ids[:, None] == head_of_lane[None, :]).astype(jnp.bfloat16)  # (H, E)

    # ---- VMEM budget: blocked operands (double-buffered) + grid-invariant consts
    #      (worst case double-buffered) + rough f32 temporaries ----
    bytes_blocked = 2 * (TB * E * 2 + 2 * TB * S * E * 2 + TB * E * 4)
    bytes_const = 2 * (3 * E * E * 2 + 3 * E * 4 + 2 * E * H * 2)
    bytes_tmps = 8 * TB * S * E * 4
    vmem_limit = int(min(max(bytes_blocked + bytes_const + bytes_tmps + (2 << 20),
                             32 << 20), 64 << 20))  # 64 MiB cap keeps v7x safe

    compiler_params = pltpu.CompilerParams(
        dimension_semantics=("parallel",),
        vmem_limit_bytes=vmem_limit)

    def kernel(q_ref, k_ref, v_ref,
               wq_ref, bq_ref, wk_ref, bk_ref, wv_ref, bv_ref,
               seh_ref, she_ref, out_ref):
        f32 = jnp.float32
        bf16 = jnp.bfloat16

        # ---- Linear projections: one big bf16 MXU matmul each, f32 accumulation ----
        q = jnp.dot(q_ref[...], wq_ref[...], preferred_element_type=f32) + bq_ref[...]  # (TB, E)
        k = jnp.dot(k_ref[...], wk_ref[...], preferred_element_type=f32) + bk_ref[...]  # (TB*S, E)
        v = jnp.dot(v_ref[...], wv_ref[...], preferred_element_type=f32) + bv_ref[...]  # (TB*S, E)

        q = q * scale                                   # f32 scale, kept out of the bf16 selector

        k3 = k.reshape(TB, S, E)
        v3 = v.reshape(TB, S, E)

        # broadcast each query row over its S key rows: pure sublane broadcast, no matmul
        qk = k3 * q.reshape(TB, 1, E)                   # (TB, S, E)  f32, VPU

        # compact per-head scores: contract the d_k lanes of each head on the MXU
        scores = jnp.dot(qk.reshape(TB * S, E).astype(bf16), seh_ref[...],
                         preferred_element_type=f32).reshape(TB, S, H)   # (TB, S, H)

        # numerically stable softmax over S, per (batch row, head) — compact (H lanes)
        m = jnp.max(scores, axis=1, keepdims=True)      # (TB, 1, H)
        e = jnp.exp(scores - m)                         # (TB, S, H)  -> d_k x fewer EUP exps

        # expand per-head probabilities back to E lanes (tiny K=H matmul)
        e_exp = jnp.dot(e.reshape(TB * S, H).astype(bf16), she_ref[...],
                        preferred_element_type=f32).reshape(TB, S, E)    # (TB, S, E)

        # softmax numerator / denominator as sublane reductions over S (XLU, not MXU)
        num = jnp.sum(e_exp * v3, axis=1)               # (TB, E)
        den = jnp.sum(e_exp, axis=1)                    # (TB, E)

        out_ref[...] = num * pl.reciprocal(den, approx=True)             # (TB, E) f32

    def _const_specs(single_buffered):
        # grid-invariant operands: constant index_map; single-buffer when supported
        kw = {"pipeline_mode": pl.Buffered(1)} if single_buffered else {}
        w_spec = pl.BlockSpec((E, E), lambda i: (0, 0), **kw)
        b_spec = pl.BlockSpec((1, E), lambda i: (0, 0), **kw)
        seh_spec = pl.BlockSpec((E, H), lambda i: (0, 0), **kw)
        she_spec = pl.BlockSpec((H, E), lambda i: (0, 0), **kw)
        return w_spec, b_spec, seh_spec, she_spec

    def forward(raw_query, raw_keys, raw_values, params):
        B = raw_query.shape[0]
        wq_t, bq, wk_t, bk, wv_t, bv = params

        # pad the batch up to a multiple of the batch block (padded rows are dropped)
        B_pad = pl.cdiv(B, TB) * TB
        pad = B_pad - B
        if pad:
            raw_query = jnp.pad(raw_query, ((0, pad), (0, 0)))
            raw_keys = jnp.pad(raw_keys, ((0, pad), (0, 0), (0, 0)))
            raw_values = jnp.pad(raw_values, ((0, pad), (0, 0), (0, 0)))

        # bf16 activations fed straight from HBM (halves K/V traffic, no in-kernel cast)
        q_bf = raw_query.astype(jnp.bfloat16)
        k_bf = raw_keys.reshape(B_pad * S, E).astype(jnp.bfloat16)
        v_bf = raw_values.reshape(B_pad * S, E).astype(jnp.bfloat16)

        wq_bf = wq_t.astype(jnp.bfloat16)
        wk_bf = wk_t.astype(jnp.bfloat16)
        wv_bf = wv_t.astype(jnp.bfloat16)
        bq2 = bq.reshape(1, E).astype(jnp.float32)
        bk2 = bk.reshape(1, E).astype(jnp.float32)
        bv2 = bv.reshape(1, E).astype(jnp.float32)

        def _run(single_buffered):
            w_spec, b_spec, seh_spec, she_spec = _const_specs(single_buffered)
            return pl.pallas_call(
                kernel,
                out_shape=jax.ShapeDtypeStruct((B_pad, E), jnp.float32),
                grid=(B_pad // TB,),
                in_specs=[
                    pl.BlockSpec((TB, E), lambda i: (i, 0)),        # raw_query block (bf16)
                    pl.BlockSpec((TB * S, E), lambda i: (i, 0)),    # keys, flattened (bf16)
                    pl.BlockSpec((TB * S, E), lambda i: (i, 0)),    # values, flattened (bf16)
                    w_spec, b_spec,                                  # W_q^T, b_q
                    w_spec, b_spec,                                  # W_k^T, b_k
                    w_spec, b_spec,                                  # W_v^T, b_v
                    seh_spec, she_spec,                              # head selectors (E,H)/(H,E)
                ],
                out_specs=pl.BlockSpec((TB, E), lambda i: (i, 0)),
                compiler_params=compiler_params,
            )(q_bf, k_bf, v_bf, wq_bf, bq2, wk_bf, bk2, wv_bf, bv2, sel_eh, sel_he)

        try:
            out = _run(True)      # single-buffered resident weights/selectors
        except Exception:         # pl.Buffered(1) unsupported -> default double-buffering
            out = _run(False)
        return out[:B]

    return forward


def reference_forward(raw_query, raw_keys, raw_values, params, embd_dim, num_head):
    """Pure-JAX (f32) replica of the PyTorch module forward, for verification."""
    d_k = embd_dim // num_head
    wq_t, bq, wk_t, bk, wv_t, bv = params
    q = raw_query @ wq_t + bq                      # (B, E)
    k = raw_keys @ wk_t + bk                       # (B, S, E)
    v = raw_values @ wv_t + bv
    B, S, E = k.shape
    q = q.reshape(B, 1, num_head, d_k).transpose(0, 2, 1, 3)   # (B, H, 1, d_k)
    k = k.reshape(B, S, num_head, d_k).transpose(0, 2, 1, 3)   # (B, H, S, d_k)
    v = v.reshape(B, S, num_head, d_k).transpose(0, 2, 1, 3)
    scores = jnp.einsum('bhqd,bhkd->bhqk', q, k) / math.sqrt(d_k)
    probs = jax.nn.softmax(scores, axis=-1)
    out = jnp.einsum('bhqk,bhkd->bhqd', probs, v)[:, :, 0, :]  # (B, H, d_k)
    return out.reshape(B, num_head * d_k)


if __name__ == "__main__":
    B, E, H, S = 2, 32, 4, 8

    key = jax.random.PRNGKey(0)
    keys = jax.random.split(key, 9)
    raw_query = jax.random.normal(keys[0], (B, E), dtype=jnp.float32)
    raw_keys = jax.random.normal(keys[1], (B, S, E), dtype=jnp.float32)
    raw_values = jax.random.normal(keys[2], (B, S, E), dtype=jnp.float32)

    # deterministic "Linear" parameters; weights stored pre-transposed (in, out)
    wq_t = 0.1 * jax.random.normal(keys[3], (E, E), dtype=jnp.float32)
    wk_t = 0.1 * jax.random.normal(keys[4], (E, E), dtype=jnp.float32)
    wv_t = 0.1 * jax.random.normal(keys[5], (E, E), dtype=jnp.float32)
    bq = 0.1 * jax.random.normal(keys[6], (E,), dtype=jnp.float32)
    bk = 0.1 * jax.random.normal(keys[7], (E,), dtype=jnp.float32)
    bv = 0.1 * jax.random.normal(keys[8], (E,), dtype=jnp.float32)
    params = (wq_t, bq, wk_t, bk, wv_t, bv)

    forward = make_mha_forward(E, H, S, batch_block=8)
    out = forward(raw_query, raw_keys, raw_values, params)
    out = jax.block_until_ready(out)

    ref = reference_forward(raw_query, raw_keys, raw_values, params, E, H)
    assert out.shape == (B, E), out.shape
    # bf16 inputs/weights + bf16 attention-dot operands + approx reciprocal -> inference tolerance
    assert jnp.allclose(out, ref, atol=3e-2, rtol=3e-2), \
        f"max abs err {jnp.max(jnp.abs(out - ref))}"

    print("KERNEL_OK")
</pallas_src>

<mosaic_0001>
module attributes {stable_mosaic.version = 11 : i64} {
  func.func @kernel(%arg0: i32, %arg1: memref<8x32xbf16, #tpu.memory_space<vmem>>, %arg2: memref<64x32xbf16, #tpu.memory_space<vmem>>, %arg3: memref<64x32xbf16, #tpu.memory_space<vmem>>, %arg4: memref<32x32xbf16, #tpu.memory_space<vmem>>, %arg5: memref<1x32xf32, #tpu.memory_space<vmem>>, %arg6: memref<32x32xbf16, #tpu.memory_space<vmem>>, %arg7: memref<1x32xf32, #tpu.memory_space<vmem>>, %arg8: memref<32x32xbf16, #tpu.memory_space<vmem>>, %arg9: memref<1x32xf32, #tpu.memory_space<vmem>>, %arg10: memref<32x4xbf16, #tpu.memory_space<vmem>>, %arg11: memref<4x32xbf16, #tpu.memory_space<vmem>>, %arg12: memref<8x32xf32, #tpu.memory_space<vmem>>) attributes {dimension_semantics = [#tpu.dimension_semantics<parallel>], iteration_bounds = array<i64: 1>, scalar_prefetch = 0 : i64, scratch_operands = 0 : i64, tpu.core_type = #tpu.core_type<tc>, window_params = [{transform_indices = @transform_0, window_bounds = array<i64: 8, 32>}, {transform_indices = @transform_1, window_bounds = array<i64: 64, 32>}, {transform_indices = @transform_2, window_bounds = array<i64: 64, 32>}, {pipeline_mode = #tpu.pipeline_mode<synchronous>, transform_indices = @transform_3, window_bounds = array<i64: 32, 32>}, {pipeline_mode = #tpu.pipeline_mode<synchronous>, transform_indices = @transform_4, window_bounds = array<i64: 1, 32>}, {pipeline_mode = #tpu.pipeline_mode<synchronous>, transform_indices = @transform_5, window_bounds = array<i64: 32, 32>}, {pipeline_mode = #tpu.pipeline_mode<synchronous>, transform_indices = @transform_6, window_bounds = array<i64: 1, 32>}, {pipeline_mode = #tpu.pipeline_mode<synchronous>, transform_indices = @transform_7, window_bounds = array<i64: 32, 32>}, {pipeline_mode = #tpu.pipeline_mode<synchronous>, transform_indices = @transform_8, window_bounds = array<i64: 1, 32>}, {pipeline_mode = #tpu.pipeline_mode<synchronous>, transform_indices = @transform_9, window_bounds = array<i64: 32, 4>}, {pipeline_mode = #tpu.pipeline_mode<synchronous>, transform_indices = @transform_10, window_bounds = array<i64: 4, 32>}, {transform_indices = @transform_11, window_bounds = array<i64: 8, 32>}]} {
    %c0 = arith.constant 0 : index
    %c0_0 = arith.constant 0 : index
    %0 = vector.load %arg1[%c0, %c0_0] : memref<8x32xbf16, #tpu.memory_space<vmem>>, vector<8x32xbf16>
    %c0_1 = arith.constant 0 : index
    %c0_2 = arith.constant 0 : index
    %1 = vector.load %arg4[%c0_1, %c0_2] : memref<32x32xbf16, #tpu.memory_space<vmem>>, vector<32x32xbf16>
    %cst = arith.constant dense<0.000000e+00> : vector<8x32xf32>
    %2 = tpu.matmul %0, %1, %cst {dimension_numbers = #tpu.dot_dimension_numbers<[1], [0], [0], [1], [0, 0, 1, 1], [], []>} : vector<8x32xbf16>, vector<32x32xbf16>, vector<8x32xf32> -> vector<8x32xf32>
    %c0_3 = arith.constant 0 : index
    %c0_4 = arith.constant 0 : index
    %3 = vector.load %arg5[%c0_3, %c0_4] : memref<1x32xf32, #tpu.memory_space<vmem>>, vector<1x32xf32>
    %4 = vector.broadcast %3 : vector<1x32xf32> to vector<8x32xf32>
    %5 = arith.addf %2, %4 : vector<8x32xf32>
    %c0_5 = arith.constant 0 : index
    %c0_6 = arith.constant 0 : index
    %6 = vector.load %arg2[%c0_5, %c0_6] : memref<64x32xbf16, #tpu.memory_space<vmem>>, vector<64x32xbf16>
    %c0_7 = arith.constant 0 : index
    %c0_8 = arith.constant 0 : index
    %7 = vector.load %arg6[%c0_7, %c0_8] : memref<32x32xbf16, #tpu.memory_space<vmem>>, vector<32x32xbf16>
    %cst_9 = arith.constant dense<0.000000e+00> : vector<64x32xf32>
    %8 = tpu.matmul %6, %7, %cst_9 {dimension_numbers = #tpu.dot_dimension_numbers<[1], [0], [0], [1], [0, 0, 1, 1], [], []>} : vector<64x32xbf16>, vector<32x32xbf16>, vector<64x32xf32> -> vector<64x32xf32>
    %c0_10 = arith.constant 0 : index
    %c0_11 = arith.constant 0 : index
    %9 = vector.load %arg7[%c0_10, %c0_11] : memref<1x32xf32, #tpu.memory_space<vmem>>, vector<1x32xf32>
    %10 = vector.broadcast %9 : vector<1x32xf32> to vector<64x32xf32>
    %11 = arith.addf %8, %10 : vector<64x32xf32>
    %c0_12 = arith.constant 0 : index
    %c0_13 = arith.constant 0 : index
    %12 = vector.load %arg3[%c0_12, %c0_13] : memref<64x32xbf16, #tpu.memory_space<vmem>>, vector<64x32xbf16>
    %c0_14 = arith.constant 0 : index
    %c0_15 = arith.constant 0 : index
    %13 = vector.load %arg8[%c0_14, %c0_15] : memref<32x32xbf16, #tpu.memory_space<vmem>>, vector<32x32xbf16>
    %cst_16 = arith.constant dense<0.000000e+00> : vector<64x32xf32>
    %14 = tpu.matmul %12, %13, %cst_16 {dimension_numbers = #tpu.dot_dimension_numbers<[1], [0], [0], [1], [0, 0, 1, 1], [], []>} : vector<64x32xbf16>, vector<32x32xbf16>, vector<64x32xf32> -> vector<64x32xf32>
    %c0_17 = arith.constant 0 : index
    %c0_18 = arith.constant 0 : index
    %15 = vector.load %arg9[%c0_17, %c0_18] : memref<1x32xf32, #tpu.memory_space<vmem>>, vector<1x32xf32>
    %16 = vector.broadcast %15 : vector<1x32xf32> to vector<64x32xf32>
    %17 = arith.addf %14, %16 : vector<64x32xf32>
    %cst_19 = arith.constant 0.353553385 : f32
    %18 = vector.broadcast %cst_19 : f32 to vector<8x32xf32>
    %19 = arith.mulf %5, %18 : vector<8x32xf32>
    %20 = vector.shape_cast %11 : vector<64x32xf32> to vector<8x8x32xf32>
    %21 = vector.shape_cast %17 : vector<64x32xf32> to vector<8x8x32xf32>
    %22 = vector.shape_cast %19 : vector<8x32xf32> to vector<8x1x32xf32>
    %23 = vector.broadcast %22 : vector<8x1x32xf32> to vector<8x8x32xf32>
    %24 = arith.mulf %20, %23 : vector<8x8x32xf32>
    %25 = vector.shape_cast %24 : vector<8x8x32xf32> to vector<64x32xf32>
    %26 = arith.truncf %25 : vector<64x32xf32> to vector<64x32xbf16>
    %c0_20 = arith.constant 0 : index
    %c0_21 = arith.constant 0 : index
    %27 = vector.load %arg10[%c0_20, %c0_21] : memref<32x4xbf16, #tpu.memory_space<vmem>>, vector<32x4xbf16>
    %cst_22 = arith.constant dense<0.000000e+00> : vector<64x4xf32>
    %28 = tpu.matmul %26, %27, %cst_22 {dimension_numbers = #tpu.dot_dimension_numbers<[1], [0], [0], [1], [0, 0, 1, 1], [], []>} : vector<64x32xbf16>, vector<32x4xbf16>, vector<64x4xf32> -> vector<64x4xf32>
    %29 = vector.shape_cast %28 : vector<64x4xf32> to vector<8x8x4xf32>
    %cst_23 = arith.constant dense<0xFF800000> : vector<8x4xf32>
    %30 = vector.multi_reduction <maximumf>, %29, %cst_23 [1] : vector<8x8x4xf32> to vector<8x4xf32>
    %31 = vector.shape_cast %30 : vector<8x4xf32> to vector<8x1x4xf32>
    %32 = vector.broadcast %31 : vector<8x1x4xf32> to vector<8x8x4xf32>
    %33 = arith.subf %29, %32 : vector<8x8x4xf32>
    %34 = math.exp %33 : vector<8x8x4xf32>
    %35 = vector.shape_cast %34 : vector<8x8x4xf32> to vector<64x4xf32>
    %36 = arith.truncf %35 : vector<64x4xf32> to vector<64x4xbf16>
    %c0_24 = arith.constant 0 : index
    %c0_25 = arith.constant 0 : index
    %37 = vector.load %arg11[%c0_24, %c0_25] : memref<4x32xbf16, #tpu.memory_space<vmem>>, vector<4x32xbf16>
    %cst_26 = arith.constant dense<0.000000e+00> : vector<64x32xf32>
    %38 = tpu.matmul %36, %37, %cst_26 {dimension_numbers = #tpu.dot_dimension_numbers<[1], [0], [0], [1], [0, 0, 1, 1], [], []>} : vector<64x4xbf16>, vector<4x32xbf16>, vector<64x32xf32> -> vector<64x32xf32>
    %39 = vector.shape_cast %38 : vector<64x32xf32> to vector<8x8x32xf32>
    %40 = arith.mulf %39, %21 : vector<8x8x32xf32>
    %cst_27 = arith.constant dense<0.000000e+00> : vector<8x32xf32>
    %41 = vector.multi_reduction <add>, %40, %cst_27 [1] : vector<8x8x32xf32> to vector<8x32xf32>
    %cst_28 = arith.constant dense<0.000000e+00> : vector<8x32xf32>
    %42 = vector.multi_reduction <add>, %39, %cst_28 [1] : vector<8x8x32xf32> to vector<8x32xf32>
    %43 = tpu.reciprocal %42 {approx = true} : vector<8x32xf32> -> vector<8x32xf32>
    %44 = arith.mulf %41, %43 : vector<8x32xf32>
    %c0_29 = arith.constant 0 : index
    %c0_30 = arith.constant 0 : index
    %45 = vector.load %arg12[%c0_29, %c0_30] : memref<8x32xf32, #tpu.memory_space<vmem>>, vector<8x32xf32>
    tpu.vector_store %arg12[%c0_29, %c0_30], %44 {strides = array<i32>} : memref<8x32xf32, #tpu.memory_space<vmem>>, vector<8x32xf32>,
    return
  }
  func.func @transform_0(%arg0: i32) -> (i32, i32) {
    %c0_i32 = arith.constant 0 : i32
    %c0_i32_0 = arith.constant 0 : i32
    return %arg0, %c0_i32 : i32, i32
  }
  func.func @transform_1(%arg0: i32) -> (i32, i32) {
    %c0_i32 = arith.constant 0 : i32
    %c0_i32_0 = arith.constant 0 : i32
    return %arg0, %c0_i32 : i32, i32
  }
  func.func @transform_2(%arg0: i32) -> (i32, i32) {
    %c0_i32 = arith.constant 0 : i32
    %c0_i32_0 = arith.constant 0 : i32
    return %arg0, %c0_i32 : i32, i32
  }
  func.func @transform_3(%arg0: i32) -> (i32, i32) {
    %c0_i32 = arith.constant 0 : i32
    %c0_i32_0 = arith.constant 0 : i32
    %c0_i32_1 = arith.constant 0 : i32
    return %c0_i32, %c0_i32_0 : i32, i32
  }
  func.func @transform_4(%arg0: i32) -> (i32, i32) {
    %c0_i32 = arith.constant 0 : i32
    %c0_i32_0 = arith.constant 0 : i32
    %c0_i32_1 = arith.constant 0 : i32
    return %c0_i32, %c0_i32_0 : i32, i32
  }
  func.func @transform_5(%arg0: i32) -> (i32, i32) {
    %c0_i32 = arith.constant 0 : i32
    %c0_i32_0 = arith.constant 0 : i32
    %c0_i32_1 = arith.constant 0 : i32
    return %c0_i32, %c0_i32_0 : i32, i32
  }
  func.func @transform_6(%arg0: i32) -> (i32, i32) {
    %c0_i32 = arith.constant 0 : i32
    %c0_i32_0 = arith.constant 0 : i32
    %c0_i32_1 = arith.constant 0 : i32
    return %c0_i32, %c0_i32_0 : i32, i32
  }
  func.func @transform_7(%arg0: i32) -> (i32, i32) {
    %c0_i32 = arith.constant 0 : i32
    %c0_i32_0 = arith.constant 0 : i32
    %c0_i32_1 = arith.constant 0 : i32
    return %c0_i32, %c0_i32_0 : i32, i32
  }
  func.func @transform_8(%arg0: i32) -> (i32, i32) {
    %c0_i32 = arith.constant 0 : i32
    %c0_i32_0 = arith.constant 0 : i32
    %c0_i32_1 = arith.constant 0 : i32
    return %c0_i32, %c0_i32_0 : i32, i32
  }
  func.func @transform_9(%arg0: i32) -> (i32, i32) {
    %c0_i32 = arith.constant 0 : i32
    %c0_i32_0 = arith.constant 0 : i32
    %c0_i32_1 = arith.constant 0 : i32
    return %c0_i32, %c0_i32_0 : i32, i32
  }
  func.func @transform_10(%arg0: i32) -> (i32, i32) {
    %c0_i32 = arith.constant 0 : i32
    %c0_i32_0 = arith.constant 0 : i32
    %c0_i32_1 = arith.constant 0 : i32
    return %c0_i32, %c0_i32_0 : i32, i32
  }
  func.func @transform_11(%arg0: i32) -> (i32, i32) {
    %c0_i32 = arith.constant 0 : i32
    %c0_i32_0 = arith.constant 0 : i32
    return %arg0, %c0_i32 : i32, i32
  }
}

module attributes {stable_mosaic.version = 11 : i64} {
  func.func @kernel(%arg0: i32, %arg1: memref<8x32xbf16, #tpu.memory_space<vmem>>, %arg2: memref<64x32xbf16, #tpu.memory_space<vmem>>, %arg3: memref<64x32xbf16, #tpu.memory_space<vmem>>, %arg4: memref<32x32xbf16, #tpu.memory_space<vmem>>, %arg5: memref<1x32xf32, #tpu.memory_space<vmem>>, %arg6: memref<32x32xbf16, #tpu.memory_space<vmem>>, %arg7: memref<1x32xf32, #tpu.memory_space<vmem>>, %arg8: memref<32x32xbf16, #tpu.memory_space<vmem>>, %arg9: memref<1x32xf32, #tpu.memory_space<vmem>>, %arg10: memref<32x4xbf16, #tpu.memory_space<vmem>>, %arg11: memref<4x32xbf16, #tpu.memory_space<vmem>>, %arg12: memref<8x32xf32, #tpu.memory_space<vmem>>) attributes {dimension_semantics = [#tpu.dimension_semantics<parallel>], iteration_bounds = array<i64: 1>, scalar_prefetch = 0 : i64, scratch_operands = 0 : i64, tpu.core_type = #tpu.core_type<tc>, window_params = [{transform_indices = @transform_0, window_bounds = array<i64: 8, 32>}, {transform_indices = @transform_1, window_bounds = array<i64: 64, 32>}, {transform_indices = @transform_2, window_bounds = array<i64: 64, 32>}, {pipeline_mode = #tpu.pipeline_mode<synchronous>, transform_indices = @transform_3, window_bounds = array<i64: 32, 32>}, {pipeline_mode = #tpu.pipeline_mode<synchronous>, transform_indices = @transform_4, window_bounds = array<i64: 1, 32>}, {pipeline_mode = #tpu.pipeline_mode<synchronous>, transform_indices = @transform_5, window_bounds = array<i64: 32, 32>}, {pipeline_mode = #tpu.pipeline_mode<synchronous>, transform_indices = @transform_6, window_bounds = array<i64: 1, 32>}, {pipeline_mode = #tpu.pipeline_mode<synchronous>, transform_indices = @transform_7, window_bounds = array<i64: 32, 32>}, {pipeline_mode = #tpu.pipeline_mode<synchronous>, transform_indices = @transform_8, window_bounds = array<i64: 1, 32>}, {pipeline_mode = #tpu.pipeline_mode<synchronous>, transform_indices = @transform_9, window_bounds = array<i64: 32, 4>}, {pipeline_mode = #tpu.pipeline_mode<synchronous>, transform_indices = @transform_10, window_bounds = array<i64: 4, 32>}, {transform_indices = @transform_11, window_bounds = array<i64: 8, 32>}]} {
    %c0 = arith.constant 0 : index
    %c0_0 = arith.constant 0 : index
    %0 = vector.load %arg1[%c0, %c0_0] : memref<8x32xbf16, #tpu.memory_space<vmem>>, vector<8x32xbf16>
    %c0_1 = arith.constant 0 : index
    %c0_2 = arith.constant 0 : index
    %1 = vector.load %arg4[%c0_1, %c0_2] : memref<32x32xbf16, #tpu.memory_space<vmem>>, vector<32x32xbf16>
    %cst = arith.constant dense<0.000000e+00> : vector<8x32xf32>
    %2 = tpu.matmul %0, %1, %cst {dimension_numbers = #tpu.dot_dimension_numbers<[1], [0], [0], [1], [0, 0, 1, 1], [], []>} : vector<8x32xbf16>, vector<32x32xbf16>, vector<8x32xf32> -> vector<8x32xf32>
    %c0_3 = arith.constant 0 : index
    %c0_4 = arith.constant 0 : index
    %3 = vector.load %arg5[%c0_3, %c0_4] : memref<1x32xf32, #tpu.memory_space<vmem>>, vector<1x32xf32>
    %4 = vector.broadcast %3 : vector<1x32xf32> to vector<8x32xf32>
    %5 = arith.addf %2, %4 : vector<8x32xf32>
    %c0_5 = arith.constant 0 : index
    %c0_6 = arith.constant 0 : index
    %6 = vector.load %arg2[%c0_5, %c0_6] : memref<64x32xbf16, #tpu.memory_space<vmem>>, vector<64x32xbf16>
    %c0_7 = arith.constant 0 : index
    %c0_8 = arith.constant 0 : index
    %7 = vector.load %arg6[%c0_7, %c0_8] : memref<32x32xbf16, #tpu.memory_space<vmem>>, vector<32x32xbf16>
    %cst_9 = arith.constant dense<0.000000e+00> : vector<64x32xf32>
    %8 = tpu.matmul %6, %7, %cst_9 {dimension_numbers = #tpu.dot_dimension_numbers<[1], [0], [0], [1], [0, 0, 1, 1], [], []>} : vector<64x32xbf16>, vector<32x32xbf16>, vector<64x32xf32> -> vector<64x32xf32>
    %c0_10 = arith.constant 0 : index
    %c0_11 = arith.constant 0 : index
    %9 = vector.load %arg7[%c0_10, %c0_11] : memref<1x32xf32, #tpu.memory_space<vmem>>, vector<1x32xf32>
    %10 = vector.broadcast %9 : vector<1x32xf32> to vector<64x32xf32>
    %11 = arith.addf %8, %10 : vector<64x32xf32>
    %c0_12 = arith.constant 0 : index
    %c0_13 = arith.constant 0 : index
    %12 = vector.load %arg3[%c0_12, %c0_13] : memref<64x32xbf16, #tpu.memory_space<vmem>>, vector<64x32xbf16>
    %c0_14 = arith.constant 0 : index
    %c0_15 = arith.constant 0 : index
    %13 = vector.load %arg8[%c0_14, %c0_15] : memref<32x32xbf16, #tpu.memory_space<vmem>>, vector<32x32xbf16>
    %cst_16 = arith.constant dense<0.000000e+00> : vector<64x32xf32>
    %14 = tpu.matmul %12, %13, %cst_16 {dimension_numbers = #tpu.dot_dimension_numbers<[1], [0], [0], [1], [0, 0, 1, 1], [], []>} : vector<64x32xbf16>, vector<32x32xbf16>, vector<64x32xf32> -> vector<64x32xf32>
    %c0_17 = arith.constant 0 : index
    %c0_18 = arith.constant 0 : index
    %15 = vector.load %arg9[%c0_17, %c0_18] : memref<1x32xf32, #tpu.memory_space<vmem>>, vector<1x32xf32>
    %16 = vector.broadcast %15 : vector<1x32xf32> to vector<64x32xf32>
    %17 = arith.addf %14, %16 : vector<64x32xf32>
    %cst_19 = arith.constant 0.353553385 : f32
    %18 = vector.broadcast %cst_19 : f32 to vector<8x32xf32>
    %19 = arith.mulf %5, %18 : vector<8x32xf32>
    %20 = vector.shape_cast %11 : vector<64x32xf32> to vector<8x8x32xf32>
    %21 = vector.shape_cast %17 : vector<64x32xf32> to vector<8x8x32xf32>
    %22 = vector.shape_cast %19 : vector<8x32xf32> to vector<8x1x32xf32>
    %23 = vector.broadcast %22 : vector<8x1x32xf32> to vector<8x8x32xf32>
    %24 = arith.mulf %20, %23 : vector<8x8x32xf32>
    %25 = vector.shape_cast %24 : vector<8x8x32xf32> to vector<64x32xf32>
    %26 = arith.truncf %25 : vector<64x32xf32> to vector<64x32xbf16>
    %c0_20 = arith.constant 0 : index
    %c0_21 = arith.constant 0 : index
    %27 = vector.load %arg10[%c0_20, %c0_21] : memref<32x4xbf16, #tpu.memory_space<vmem>>, vector<32x4xbf16>
    %cst_22 = arith.constant dense<0.000000e+00> : vector<64x4xf32>
    %28 = tpu.matmul %26, %27, %cst_22 {dimension_numbers = #tpu.dot_dimension_numbers<[1], [0], [0], [1], [0, 0, 1, 1], [], []>} : vector<64x32xbf16>, vector<32x4xbf16>, vector<64x4xf32> -> vector<64x4xf32>
    %29 = vector.shape_cast %28 : vector<64x4xf32> to vector<8x8x4xf32>
    %cst_23 = arith.constant dense<0xFF800000> : vector<8x4xf32>
    %30 = vector.multi_reduction <maximumf>, %29, %cst_23 [1] : vector<8x8x4xf32> to vector<8x4xf32>
    %31 = vector.shape_cast %30 : vector<8x4xf32> to vector<8x1x4xf32>
    %32 = vector.broadcast %31 : vector<8x1x4xf32> to vector<8x8x4xf32>
    %33 = arith.subf %29, %32 : vector<8x8x4xf32>
    %34 = math.exp %33 : vector<8x8x4xf32>
    %35 = vector.shape_cast %34 : vector<8x8x4xf32> to vector<64x4xf32>
    %36 = arith.truncf %35 : vector<64x4xf32> to vector<64x4xbf16>
    %c0_24 = arith.constant 0 : index
    %c0_25 = arith.constant 0 : index
    %37 = vector.load %arg11[%c0_24, %c0_25] : memref<4x32xbf16, #tpu.memory_space<vmem>>, vector<4x32xbf16>
    %cst_26 = arith.constant dense<0.000000e+00> : vector<64x32xf32>
    %38 = tpu.matmul %36, %37, %cst_26 {dimension_numbers = #tpu.dot_dimension_numbers<[1], [0], [0], [1], [0, 0, 1, 1], [], []>} : vector<64x4xbf16>, vector<4x32xbf16>, vector<64x32xf32> -> vector<64x32xf32>
    %39 = vector.shape_cast %38 : vector<64x32xf32> to vector<8x8x32xf32>
    %40 = arith.mulf %39, %21 : vector<8x8x32xf32>
    %cst_27 = arith.constant dense<0.000000e+00> : vector<8x32xf32>
    %41 = vector.multi_reduction <add>, %40, %cst_27 [1] : vector<8x8x32xf32> to vector<8x32xf32>
    %cst_28 = arith.constant dense<0.000000e+00> : vector<8x32xf32>
    %42 = vector.multi_reduction <add>, %39, %cst_28 [1] : vector<8x8x32xf32> to vector<8x32xf32>
    %43 = tpu.reciprocal %42 {approx = true} : vector<8x32xf32> -> vector<8x32xf32>
    %44 = arith.mulf %41, %43 : vector<8x32xf32>
    %c0_29 = arith.constant 0 : index
    %c0_30 = arith.constant 0 : index
    %45 = vector.load %arg12[%c0_29, %c0_30] : memref<8x32xf32, #tpu.memory_space<vmem>>, vector<8x32xf32>
    tpu.vector_store %arg12[%c0_29, %c0_30], %44 {strides = array<i32>} : memref<8x32xf32, #tpu.memory_space<vmem>>, vector<8x32xf32>,
    return
  }
  func.func @transform_0(%arg0: i32) -> (i32, i32) {
    %c0_i32 = arith.constant 0 : i32
    %c0_i32_0 = arith.constant 0 : i32
    return %arg0, %c0_i32 : i32, i32
  }
  func.func @transform_1(%arg0: i32) -> (i32, i32) {
    %c0_i32 = arith.constant 0 : i32
    %c0_i32_0 = arith.constant 0 : i32
    return %arg0, %c0_i32 : i32, i32
  }
  func.func @transform_2(%arg0: i32) -> (i32, i32) {
    %c0_i32 = arith.constant 0 : i32
    %c0_i32_0 = arith.constant 0 : i32
    return %arg0, %c0_i32 : i32, i32
  }
  func.func @transform_3(%arg0: i32) -> (i32, i32) {
    %c0_i32 = arith.constant 0 : i32
    %c0_i32_0 = arith.constant 0 : i32
    %c0_i32_1 = arith.constant 0 : i32
    return %c0_i32, %c0_i32_0 : i32, i32
  }
  func.func @transform_4(%arg0: i32) -> (i32, i32) {
    %c0_i32 = arith.constant 0 : i32
    %c0_i32_0 = arith.constant 0 : i32
    %c0_i32_1 = arith.constant 0 : i32
    return %c0_i32, %c0_i32_0 : i32, i32
  }
  func.func @transform_5(%arg0: i32) -> (i32, i32) {
    %c0_i32 = arith.constant 0 : i32
    %c0_i32_0 = arith.constant 0 : i32
    %c0_i32_1 = arith.constant 0 : i32
    return %c0_i32, %c0_i32_0 : i32, i32
  }
  func.func @transform_6(%arg0: i32) -> (i32, i32) {
    %c0_i32 = arith.constant 0 : i32
    %c0_i32_0 = arith.constant 0 : i32
    %c0_i32_1 = arith.constant 0 : i32
    return %c0_i32, %c0_i32_0 : i32, i32
  }
  func.func @transform_7(%arg0: i32) -> (i32, i32) {
    %c0_i32 = arith.constant 0 : i32
    %c0_i32_0 = arith.constant 0 : i32
    %c0_i32_1 = arith.constant 0 : i32
    return %c0_i32, %c0_i32_0 : i32, i32
  }
  func.func @transform_8(%arg0: i32) -> (i32, i32) {
    %c0_i32 = arith.constant 0 : i32
    %c0_i32_0 = arith.constant 0 : i32
    %c0_i32_1 = arith.constant 0 : i32
    return %c0_i32, %c0_i32_0 : i32, i32
  }
  func.func @transform_9(%arg0: i32) -> (i32, i32) {
    %c0_i32 = arith.constant 0 : i32
    %c0_i32_0 = arith.constant 0 : i32
    %c0_i32_1 = arith.constant 0 : i32
    return %c0_i32, %c0_i32_0 : i32, i32
  }
  func.func @transform_10(%arg0: i32) -> (i32, i32) {
    %c0_i32 = arith.constant 0 : i32
    %c0_i32_0 = arith.constant 0 : i32
    %c0_i32_1 = arith.constant 0 : i32
    return %c0_i32, %c0_i32_0 : i32, i32
  }
  func.func @transform_11(%arg0: i32) -> (i32, i32) {
    %c0_i32 = arith.constant 0 : i32
    %c0_i32_0 = arith.constant 0 : i32
    return %arg0, %c0_i32 : i32, i32
  }
}

</mosaic_0001>

<bundles_post_ra>
// kernel: tpu_custom_call.1
= control target key start
LH: loop header
LB: loop body
LE: loop exit
PB: predicated region body
PF: predicated region fallthrough
CT: control target
= control target key end

     0   :  { %s995_s0 = inlined_call_operand.vmem [shape: bf16[8,32], index: 0, kind: input, shape index: {}]   ;;  %s996_s1 = inlined_call_operand.vmem [shape: bf16[64,32], index: 1, kind: input, shape index: {}]   ;;  %s997_s2 = inlined_call_operand.vmem [shape: bf16[64,32], index: 2, kind: input, shape index: {}]   ;;  %s998_s3 = inlined_call_operand.vmem [shape: bf16[32,32], index: 3, kind: input, shape index: {}]   ;;  %s999_s4 = inlined_call_operand.vmem [shape: f32[1,32], index: 4, kind: input, shape index: {}]   ;;  %s1000_s5 = inlined_call_operand.vmem [shape: bf16[32,32], index: 5, kind: input, shape index: {}]   ;;  %s1001_s6 = inlined_call_operand.vmem [shape: f32[1,32], index: 6, kind: input, shape index: {}]   ;;  %s1002_s7 = inlined_call_operand.vmem [shape: bf16[32,32], index: 7, kind: input, shape index: {}]   ;;  %s1003_s8 = inlined_call_operand.vmem [shape: f32[1,32], index: 8, kind: input, shape index: {}]   ;;  %s1004_s9 = inlined_call_operand.vmem [shape: bf16[32,4], index: 9, kind: input, shape index: {}]   ;;  %s1005_s10 = inlined_call_operand.vmem [shape: bf16[4,32], index: 10, kind: input, shape index: {}]   ;;  %s1006_s11 = inlined_call_operand.hbm [shape: f32[8,32], index: 11, kind: output, shape index: {}]  }
   0x1   :  { %v739_v0 = vld [vmem:[%s998_s3 + $0x8] sm:$0xff]  ;;  %v738_v2 = vld [vmem:[%s998_s3] sm:$0xff] }
   0x2   :  { %v745_v1 = vld [vmem:[%s1000_s5 + $0x8] sm:$0xff]  ;;  %71 = vmatpush.bf16.msra.mxu0 %v739_v0  ;;  %v744_v3 = vld [vmem:[%s1000_s5] sm:$0xff] }
   0x3   :  { %144 = vmatpush.bf16.msra.mxu1 %v745_v1 }
   0x4   :  { %16 = vsyncpa [#allocation3], 0  ;;  %v740_v4 = vld [vmem:[%s996_s1] sm:$0xff]  ;;  %vm61_vm0 = vcmask 261120   ;;  %v741_v6 = vld [vmem:[%s996_s1 + $0x8] sm:$0xff]  ;;  %vm350_vm1 = vcmask 31744  }
   0x5   :  { %v40_v5 = vld [vmem:[%s995_s0] sm:$0xf]  ;;  %v742_v7 = vld [vmem:[%s996_s1 + $0x10] sm:$0xff]  ;;  %v743_v8 = vld [vmem:[%s996_s1 + $0x18] sm:$0xff]  ;;  %vm448_vm2 = vcmask 1041408   ;;  %vm625_vm3 = vcmask 1041409  }
   0x6   :  { %72 = vmatpush.bf16.msra.mxu0 %v738_v2  ;;  %v753_v9 = vld [vmem:[%s1004_s9 + $0x8] sm:$0xff]  ;;  %v752_v10 = vld [vmem:[%s1004_s9] sm:$0xff]  ;;  %vm627_vm4 = vcmask 1042434   ;;  %vm629_vm5 = vcmask 1043459   ;;  %vm631_vm6 = vcmask 1044484   ;;  %vm633_vm7 = vcmask 1045509  }
   0x7   :  { %145 = vmatpush.bf16.msra.mxu1 %v744_v3  ;;  %327 = vmatpush.bf16.msra.mxu3 %v753_v9  ;;  %v755_v11 = vld [vmem:[%s999_s4] ss:$0 sm:$0xff]  ;;  %v751_v60 = vld [vmem:[%s1002_s7 + $0x8] sm:$0xff]  ;;  %vm635_vm8 = vcmask 1046534   ;;  %s648_s12 = sshll.u32 %s1006_s11, 4  ;;  %vm637_vm9 = vcmask 1047559   ;;  %s649_s12 = int_to_ptr.hbm [resolvable:$true] %s648_s12 }
   0x8   :  { %v756_v16 = vld [vmem:[%s1001_s6] ss:$0 sm:$0xff]  ;;  %233 = vmatpush.bf16.msra.mxu2 %v751_v60 }
   0x9   :  { %665 = vmatmul.msk.bf16.vlgmr.msra.gmra.mxu0 %vm61_vm0, %v40_v5  ;;  %v750_v61 = vld [vmem:[%s1002_s7] sm:$0xff] }
   0xa   :  { %690 = vmatmul.msk.bf16.vlgmr.msra.gmra.mxu1 %vm61_vm0, %v740_v4  ;;  %v746_v62 = vld [vmem:[%s997_s2] sm:$0xff] }
   0xb   :  { %328 = vmatpush.bf16.msra.mxu3 %v752_v10  ;;  %v435_v63 = vld [vmem:[%s1005_s10] sm:$0x3] }
   0xc   :  { %234 = vmatpush.bf16.msra.mxu2 %v750_v61  ;;  %v450_v0 = vsel %vm448_vm2, %v435_v63, 0 }
   0xd   :  { %459 = vmatpush.bf16.msrb.mxu0 %v450_v0 }
   0xf   :  { %718 = vmatmul.msk.bf16.vlgmr.msra.gmra.mxu2 %vm61_vm0, %v746_v62 }
  0x1a   :  { %691 = vmatmul.msk.bf16.gmra.mxu1 %vm61_vm0, %v741_v6  ;;  %v747_v6 = vld [vmem:[%s997_s2 + $0x8] sm:$0xff] }
  0x1f   :  { %719 = vmatmul.msk.bf16.gmra.mxu2 %vm61_vm0, %v747_v6 }
  0x2a   :  { %692 = vmatmul.msk.bf16.gmra.mxu1 %vm61_vm0, %v742_v7 }
  0x3a   :  { %693 = vmatmul.msk.bf16.gmra.mxu1 %vm61_vm0, %v743_v8 }
  0x86   :  { %v74_v12 = vpop.f32.mrf.mxu0 }
  0x87   :  { %v147_v13 = vpop.f32.mrf.mxu1  ;;  %v75_v14 = vadd.f32 %v755_v11, %v74_v12 }
  0x88   :  { %v148_v22 = vadd.f32 %v756_v16, %v147_v13 }
  0x89   :  { %v256_v15 = vmul.f32 0.35355338, %v75_v14 }
  0x8b   :  { %v258_v17 = vrot.slane %v256_v15, 1  ;;  %v265_v18 = vperm.slane %v256_v15, 0  ;;  %v259_v28 = vrot.slane %v256_v15, 2  ;;  %v260_v29 = vrot.slane %v256_v15, 3 }
  0x8c   :  { %v261_v39 = vrot.slane %v256_v15, 4  ;;  %v262_v40 = vrot.slane %v256_v15, 5  ;;  %v263_v50 = vrot.slane %v256_v15, 6  ;;  %v264_v51 = vrot.slane %v256_v15, 7 }
  0x8d   :  { %v266_v19 = vperm.slane %v258_v17, 0  ;;  %v281_v24 = vmul.f32 %v265_v18, %v148_v22  ;;  %v267_v32 = vperm.slane %v259_v28, 0  ;;  %v268_v34 = vperm.slane %v260_v29, 0 }
  0x8e   :  { %v76_v20 = vpop.f32.mrf.mxu0  ;;  %v269_v43 = vperm.slane %v261_v39, 0  ;;  %v270_v45 = vperm.slane %v262_v40, 0  ;;  %v271_v54 = vperm.slane %v263_v50, 0  ;;  %v272_v56 = vperm.slane %v264_v51, 0  ;;  %v749_v50 = vld [vmem:[%s997_s2 + $0x18] sm:$0xff] }
  0x8f   :  { %v149_v21 = vpop.f32.mrf.mxu1 }
  0x90   :  { %v150_v23 = vadd.f32 %v756_v16, %v149_v21 }
  0x92   :  { %v282_v25 = vmul.f32 %v266_v19, %v150_v23 }
  0x94   :  { %v289_v26 = vpack.c.bf16 %v282_v25, %v281_v24 }
  0x96   :  { %730 = vmatmul.msk.bf16.vlgmr.msra.gmra.mxu3 %vm61_vm0, %v289_v26  ;;  %v748_v26 = vld [vmem:[%s997_s2 + $0x10] sm:$0xff] }
  0x97   :  { %v152_v27 = vpop.f32.mrf.mxu1  ;;  %720 = vmatmul.msk.bf16.gmra.mxu2 %vm61_vm0, %v748_v26 }
  0x98   :  { %v153_v30 = vadd.f32 %v756_v16, %v152_v27 }
  0x9a   :  { %v283_v35 = vmul.f32 %v267_v32, %v153_v30 }
  0x9f   :  { %v154_v31 = vpop.f32.mrf.mxu1 }
  0xa0   :  { %v155_v33 = vadd.f32 %v756_v16, %v154_v31 }
  0xa2   :  { %v284_v36 = vmul.f32 %v268_v34, %v155_v33 }
  0xa4   :  { %v290_v37 = vpack.c.bf16 %v284_v36, %v283_v35 }
  0xa6   :  { %731 = vmatmul.msk.bf16.gmra.mxu3 %vm61_vm0, %v290_v37 }
  0xa7   :  { %v157_v38 = vpop.f32.mrf.mxu1  ;;  %721 = vmatmul.msk.bf16.gmra.mxu2 %vm61_vm0, %v749_v50 }
  0xa8   :  { %v158_v41 = vadd.f32 %v756_v16, %v157_v38 }
  0xaa   :  { %v285_v46 = vmul.f32 %v269_v43, %v158_v41 }
  0xaf   :  { %v159_v42 = vpop.f32.mrf.mxu1 }
  0xb0   :  { %v160_v44 = vadd.f32 %v756_v16, %v159_v42 }
  0xb2   :  { %v286_v47 = vmul.f32 %v270_v45, %v160_v44 }
  0xb4   :  { %v291_v48 = vpack.c.bf16 %v286_v47, %v285_v46 }
  0xb6   :  { %732 = vmatmul.msk.bf16.gmra.mxu3 %vm61_vm0, %v291_v48 }
  0xb7   :  { %v162_v49 = vpop.f32.mrf.mxu1 }
  0xb8   :  { %v163_v52 = vadd.f32 %v756_v16, %v162_v49 }
  0xba   :  { %v287_v57 = vmul.f32 %v271_v54, %v163_v52 }
  0xbf   :  { %v164_v53 = vpop.f32.mrf.mxu1 }
  0xc0   :  { %v165_v55 = vadd.f32 %v756_v16, %v164_v53 }
  0xc2   :  { %v288_v58 = vmul.f32 %v272_v56, %v165_v55 }
  0xc4   :  { %v292_v59 = vpack.c.bf16 %v288_v58, %v287_v57 }
  0xc6   :  { %733 = vmatmul.msk.bf16.gmra.mxu3 %vm61_vm0, %v292_v59 }
 0x119   :  { %v330_v1 = vpop.f32.mrf.mxu3 }
 0x11a   :  { %v351_v2 = vsel %vm350_vm1, %v330_v1, -inf }
 0x11b   :  { %v352_v3 = vrot.slane %v351_v2, 4 }
 0x11d   :  { %v353_v4 = vmax.f32 %v351_v2, %v352_v3 }
 0x11f   :  { %v354_v5 = vrot.slane %v353_v4, 2 }
 0x121   :  { %v355_v7 = vmax.f32 %v353_v4, %v354_v5  ;;  %v332_v8 = vpop.f32.mrf.mxu3 }
 0x122   :  { %v358_v9 = vsel %vm350_vm1, %v332_v8, -inf }
 0x123   :  { %v356_v10 = vrot.slane %v355_v7, 1  ;;  %v359_v11 = vrot.slane %v358_v9, 4 }
 0x125   :  { %v360_v12 = vmax.f32 %v358_v9, %v359_v11  ;;  %v357_v13 = vmax.f32 %v355_v7, %v356_v10 }
 0x127   :  { %v361_v14 = vrot.slane %v360_v12, 2  ;;  %v407_v17 = vsub.f32 %v330_v1, %v357_v13 }
 0x129   :  { %v362_v15 = vmax.f32 %v360_v12, %v361_v14  ;;  %v335_v16 = vpop.f32.mrf.mxu3  ;;  %v415_v23 = vmul.f32 1.442695, %v407_v17 }
 0x12a   :  { %v365_v18 = vsel %vm350_vm1, %v335_v16, -inf }
 0x12b   :  { %v363_v19 = vrot.slane %v362_v15, 1  ;;  %v366_v20 = vrot.slane %v365_v18, 4  ;;  %758 = vpow2.f32 %v415_v23 }
 0x12d   :  { %v364_v21 = vmax.f32 %v362_v15, %v363_v19  ;;  %v367_v22 = vmax.f32 %v365_v18, %v366_v20 }
 0x12f   :  { %v408_v24 = vsub.f32 %v332_v8, %v364_v21  ;;  %v368_v25 = vrot.slane %v367_v22, 2 }
 0x131   :  { %v417_v27 = vmul.f32 1.442695, %v408_v24  ;;  %v369_v28 = vmax.f32 %v367_v22, %v368_v25  ;;  %v337_v29 = vpop.f32.mrf.mxu3  ;;  %v759_v36 = vpop.eup %758 }
 0x132   :  { %v372_v30 = vsel %vm350_vm1, %v337_v29, -inf }
 0x133   :  { %760 = vpow2.f32 %v417_v27  ;;  %v370_v31 = vrot.slane %v369_v28, 1  ;;  %v373_v32 = vrot.slane %v372_v30, 4 }
 0x135   :  { %v374_v33 = vmax.f32 %v372_v30, %v373_v32  ;;  %v371_v34 = vmax.f32 %v369_v28, %v370_v31  ;;  %v236_v32 = vpop.f32.mrf.mxu2 }
 0x137   :  { %v375_v35 = vrot.slane %v374_v33, 2  ;;  %v409_v40 = vsub.f32 %v335_v16, %v371_v34 }
 0x139   :  { %v761_v37 = vpop.eup %760  ;;  %v376_v38 = vmax.f32 %v374_v33, %v375_v35  ;;  %v340_v39 = vpop.f32.mrf.mxu3  ;;  %v419_v47 = vmul.f32 1.442695, %v409_v40 }
 0x13a   :  { %v379_v41 = vsel %vm350_vm1, %v340_v39, -inf  ;;  %v431_v42 = vpack.c.bf16 %v761_v37, %v759_v36 }
 0x13b   :  { %v377_v43 = vrot.slane %v376_v38, 1  ;;  %v380_v44 = vrot.slane %v379_v41, 4  ;;  %762 = vpow2.f32 %v419_v47 }
 0x13c   :  { %734 = vmatmul.msk.bf16.vlgmr.msrb.gmra.mxu0 %vm350_vm1, %v431_v42 }
 0x13d   :  { %v378_v45 = vmax.f32 %v376_v38, %v377_v43  ;;  %v381_v46 = vmax.f32 %v379_v41, %v380_v44  ;;  %v238_v33 = vpop.f32.mrf.mxu2  ;;  %v966_v43 = vld [vmem:[%s1003_s8] ss:$0 sm:$0xff]  ;;  %s816_s8 = smov [#allocation2]  }
 0x13e   :  { %v239_v50 = vadd.f32 %v966_v43, %v238_v33  ;;  %s646_s29 = sshll.u32 %s816_s8, 4  ;;  %s647_s29 = int_to_ptr.vmem [resolvable:$true] %s646_s29 }
 0x13f   :  { %v410_v48 = vsub.f32 %v337_v29, %v378_v45  ;;  %v382_v49 = vrot.slane %v381_v46, 2 }
 0x141   :  { %v421_v51 = vmul.f32 1.442695, %v410_v48  ;;  %v383_v52 = vmax.f32 %v381_v46, %v382_v49  ;;  %v342_v53 = vpop.f32.mrf.mxu3  ;;  %v763_v60 = vpop.eup %762  ;;  %v237_v46 = vadd.f32 %v966_v43, %v236_v32 }
 0x142   :  { %v386_v54 = vsel %vm350_vm1, %v342_v53, -inf }
 0x143   :  { %764 = vpow2.f32 %v421_v51  ;;  %v384_v55 = vrot.slane %v383_v52, 1  ;;  %v387_v56 = vrot.slane %v386_v54, 4 }
 0x145   :  { %v388_v57 = vmax.f32 %v386_v54, %v387_v56  ;;  %v385_v58 = vmax.f32 %v383_v52, %v384_v55  ;;  %v241_v35 = vpop.f32.mrf.mxu2 }
 0x147   :  { %v389_v59 = vrot.slane %v388_v57, 2  ;;  %v411_v0 = vsub.f32 %v340_v39, %v385_v58 }
 0x149   :  { %v765_v61 = vpop.eup %764  ;;  %v390_v62 = vmax.f32 %v388_v57, %v389_v59  ;;  %v345_v63 = vpop.f32.mrf.mxu3  ;;  %v423_v7 = vmul.f32 1.442695, %v411_v0  ;;  %v242_v57 = vadd.f32 %v966_v43, %v241_v35 }
 0x14a   :  { %v393_v1 = vsel %vm350_vm1, %v345_v63, -inf  ;;  %v432_v2 = vpack.c.bf16 %v765_v61, %v763_v60 }
 0x14b   :  { %v391_v3 = vrot.slane %v390_v62, 1  ;;  %v394_v4 = vrot.slane %v393_v1, 4  ;;  %766 = vpow2.f32 %v423_v7 }
 0x14c   :  { %735 = vmatmul.msk.bf16.gmra.mxu0 %vm350_vm1, %v432_v2 }
 0x14d   :  { %v392_v5 = vmax.f32 %v390_v62, %v391_v3  ;;  %v395_v6 = vmax.f32 %v393_v1, %v394_v4  ;;  %v243_v37 = vpop.f32.mrf.mxu2 }
 0x14e   :  { %v244_v4 = vadd.f32 %v966_v43, %v243_v37 }
 0x14f   :  { %v412_v8 = vsub.f32 %v342_v53, %v392_v5  ;;  %v396_v9 = vrot.slane %v395_v6, 2 }
 0x151   :  { %v425_v10 = vmul.f32 1.442695, %v412_v8  ;;  %v397_v11 = vmax.f32 %v395_v6, %v396_v9  ;;  %v347_v12 = vpop.f32.mrf.mxu3  ;;  %v767_v19 = vpop.eup %766 }
 0x152   :  { %v400_v13 = vsel %vm350_vm1, %v347_v12, -inf }
 0x153   :  { %768 = vpow2.f32 %v425_v10  ;;  %v398_v14 = vrot.slane %v397_v11, 1  ;;  %v401_v15 = vrot.slane %v400_v13, 4 }
 0x155   :  { %v402_v16 = vmax.f32 %v400_v13, %v401_v15  ;;  %v399_v17 = vmax.f32 %v397_v11, %v398_v14  ;;  %v246_v39 = vpop.f32.mrf.mxu2 }
 0x157   :  { %v403_v18 = vrot.slane %v402_v16, 2  ;;  %v413_v22 = vsub.f32 %v345_v63, %v399_v17  ;;  %v247_v63 = vadd.f32 %v966_v43, %v246_v39 }
 0x159   :  { %v769_v20 = vpop.eup %768  ;;  %v404_v21 = vmax.f32 %v402_v16, %v403_v18  ;;  %v427_v26 = vmul.f32 1.442695, %v413_v22 }
 0x15a   :  { %v433_v23 = vpack.c.bf16 %v769_v20, %v767_v19 }
 0x15b   :  { %v405_v24 = vrot.slane %v404_v21, 1  ;;  %770 = vpow2.f32 %v427_v26 }
 0x15c   :  { %736 = vmatmul.msk.bf16.gmra.mxu0 %vm350_vm1, %v433_v23 }
 0x15d   :  { %v406_v25 = vmax.f32 %v404_v21, %v405_v24  ;;  %v248_v49 = vpop.f32.mrf.mxu2 }
 0x15e   :  { %v249_v7 = vadd.f32 %v966_v43, %v248_v49 }
 0x15f   :  { %v414_v27 = vsub.f32 %v347_v12, %v406_v25 }
 0x161   :  { %v429_v28 = vmul.f32 1.442695, %v414_v27  ;;  %v771_v29 = vpop.eup %770 }
 0x163   :  { %772 = vpow2.f32 %v429_v28 }
 0x165   :  { %v251_v13 = vpop.f32.mrf.mxu2 }
 0x166   :  { %v252_v23 = vadd.f32 %v966_v43, %v251_v13 }
 0x169   :  { %v773_v30 = vpop.eup %772 }
 0x16a   :  { %v434_v31 = vpack.c.bf16 %v773_v30, %v771_v29 }
 0x16c   :  { %737 = vmatmul.msk.bf16.gmra.mxu0 %vm350_vm1, %v434_v31 }
 0x1b9   :  { %v461_v34 = vpop.f32.mrf.mxu0 }
 0x1ba   :  { %v545_v40 = vsel %vm61_vm0, %v461_v34, 0.0  ;;  %v481_v55 = vmul.f32 %v461_v34, %v237_v46 }
 0x1bb   :  { %v546_v42 = vrot.slane %v545_v40, 4 }
 0x1bc   :  { %v489_v1 = vsel %vm61_vm0, %v481_v55, 0.0 }
 0x1bd   :  { %v547_v45 = vadd.f32 %v546_v42, %v545_v40  ;;  %v490_v14 = vrot.slane %v489_v1, 4 }
 0x1bf   :  { %v548_v52 = vrot.slane %v547_v45, 2  ;;  %v491_v27 = vadd.f32 %v490_v14, %v489_v1 }
 0x1c1   :  { %v463_v36 = vpop.f32.mrf.mxu0  ;;  %v549_v61 = vadd.f32 %v548_v52, %v547_v45 }
 0x1c2   :  { %v552_v44 = vsel %vm61_vm0, %v463_v36, 0.0  ;;  %v482_v53 = vmul.f32 %v463_v36, %v239_v50 }
 0x1c3   :  { %v553_v47 = vrot.slane %v552_v44, 4  ;;  %v550_v15 = vrot.slane %v549_v61, 1 }
 0x1c4   :  { %v496_v62 = vsel %vm61_vm0, %v482_v53, 0.0  ;;  %v253_v53 = vpop.f32.mrf.mxu2 }
 0x1c5   :  { %v554_v56 = vadd.f32 %v553_v47, %v552_v44  ;;  %v497_v9 = vrot.slane %v496_v62, 4  ;;  %v551_v31 = vadd.f32 %v550_v15, %v549_v61 }
 0x1c7   :  { %v555_v2 = vrot.slane %v554_v56, 2  ;;  %v498_v24 = vadd.f32 %v497_v9, %v496_v62  ;;  %774 = vrcp.f32 %v551_v31 }
 0x1c9   :  { %v466_v38 = vpop.f32.mrf.mxu0  ;;  %v556_v18 = vadd.f32 %v555_v2, %v554_v56  ;;  %v499_v40 = vrot.slane %v498_v24, 2 }
 0x1ca   :  { %v559_v51 = vsel %vm61_vm0, %v466_v38, 0.0  ;;  %v483_v3 = vmul.f32 %v466_v38, %v242_v57 }
 0x1cb   :  { %v560_v59 = vrot.slane %v559_v51, 4  ;;  %v557_v32 = vrot.slane %v556_v18, 1  ;;  %v500_v57 = vadd.f32 %v499_v40, %v498_v24 }
 0x1cc   :  { %v503_v19 = vsel %vm61_vm0, %v483_v3, 0.0 }
 0x1cd   :  { %v561_v6 = vadd.f32 %v560_v59, %v559_v51  ;;  %v504_v28 = vrot.slane %v503_v19, 4  ;;  %v558_v49 = vadd.f32 %v557_v32, %v556_v18  ;;  %v775_v13 = vpop.eup %774 }
 0x1cf   :  { %v562_v22 = vrot.slane %v561_v6, 2  ;;  %v505_v45 = vadd.f32 %v504_v28, %v503_v19  ;;  %776 = vrcp.f32 %v558_v49 }
 0x1d1   :  { %v468_v41 = vpop.f32.mrf.mxu0  ;;  %v563_v36 = vadd.f32 %v562_v22, %v561_v6  ;;  %v506_v61 = vrot.slane %v505_v45, 2 }
 0x1d2   :  { %v566_v54 = vsel %vm61_vm0, %v468_v41, 0.0  ;;  %v484_v10 = vmul.f32 %v468_v41, %v244_v4 }
 0x1d3   :  { %v567_v60 = vrot.slane %v566_v54, 4  ;;  %v564_v55 = vrot.slane %v563_v36, 1  ;;  %v507_v14 = vadd.f32 %v506_v61, %v505_v45 }
 0x1d4   :  { %v510_v25 = vsel %vm61_vm0, %v484_v10, 0.0 }
 0x1d5   :  { %v568_v11 = vadd.f32 %v567_v60, %v566_v54  ;;  %v511_v37 = vrot.slane %v510_v25, 4  ;;  %v492_v54 = vrot.slane %v491_v27, 2  ;;  %v777_v24 = vpop.eup %776 }
 0x1d7   :  { %v569_v26 = vrot.slane %v568_v11, 2  ;;  %v512_v56 = vadd.f32 %v511_v37, %v510_v25 }
 0x1d9   :  { %v471_v48 = vpop.f32.mrf.mxu0  ;;  %v570_v41 = vadd.f32 %v569_v26, %v568_v11  ;;  %v513_v6 = vrot.slane %v512_v56, 2 }
 0x1da   :  { %v573_v58 = vsel %vm61_vm0, %v471_v48, 0.0  ;;  %v485_v16 = vmul.f32 %v471_v48, %v247_v63 }
 0x1db   :  { %v574_v0 = vrot.slane %v573_v58, 4  ;;  %v514_v22 = vadd.f32 %v513_v6, %v512_v56 }
 0x1dc   :  { %v517_v29 = vsel %vm61_vm0, %v485_v16, 0.0 }
 0x1dd   :  { %v575_v17 = vadd.f32 %v574_v0, %v573_v58  ;;  %v518_v42 = vrot.slane %v517_v29, 4  ;;  %v571_v58 = vrot.slane %v570_v41, 1  ;;  %v254_v0 = vadd.f32 %v966_v43, %v253_v53 }
 0x1df   :  { %v576_v30 = vrot.slane %v575_v17, 2  ;;  %v519_v59 = vadd.f32 %v518_v42, %v517_v29  ;;  %v572_v9 = vadd.f32 %v571_v58, %v570_v41  ;;  %v501_v29 = vrot.slane %v500_v57, 1 }
 0x1e1   :  { %v473_v5 = vpop.f32.mrf.mxu0  ;;  %v577_v46 = vadd.f32 %v576_v30, %v575_v17  ;;  %v520_v10 = vrot.slane %v519_v59, 2  ;;  %v508_v30 = vrot.slane %v507_v14, 1 }
 0x1e2   :  { %v580_v8 = vsel %vm61_vm0, %v473_v5, 0.0  ;;  %v486_v20 = vmul.f32 %v473_v5, %v249_v7  ;;  %v565_v5 = vadd.f32 %v564_v55, %v563_v36  ;;  %v515_v36 = vrot.slane %v514_v22, 1 }
 0x1e3   :  { %v581_v12 = vrot.slane %v580_v8, 4  ;;  %v578_v62 = vrot.slane %v577_v46, 1  ;;  %v521_v25 = vadd.f32 %v520_v10, %v519_v59 }
 0x1e4   :  { %v524_v33 = vsel %vm61_vm0, %v486_v20, 0.0  ;;  %778 = vrcp.f32 %v565_v5 }
 0x1e5   :  { %v582_v21 = vadd.f32 %v581_v12, %v580_v8  ;;  %v525_v47 = vrot.slane %v524_v33, 4  ;;  %v579_v15 = vadd.f32 %v578_v62, %v577_v46  ;;  %780 = vrcp.f32 %v572_v9 }
 0x1e7   :  { %v583_v34 = vrot.slane %v582_v21, 2  ;;  %v526_v63 = vadd.f32 %v525_v47, %v524_v33  ;;  %782 = vrcp.f32 %v579_v15 }
 0x1e9   :  { %v476_v35 = vpop.f32.mrf.mxu0  ;;  %v584_v50 = vadd.f32 %v583_v34, %v582_v21  ;;  %v527_v16 = vrot.slane %v526_v63, 2  ;;  %v493_v21 = vadd.f32 %v492_v54, %v491_v27  ;;  %v522_v27 = vrot.slane %v521_v25, 1 }
 0x1ea   :  { %v487_v38 = vmul.f32 %v476_v35, %v252_v23  ;;  %v587_v39 = vsel %vm61_vm0, %v476_v35, 0.0 }
 0x1eb   :  { %v588_v44 = vrot.slane %v587_v39, 4  ;;  %v585_v1 = vrot.slane %v584_v50, 1  ;;  %v528_v31 = vadd.f32 %v527_v16, %v526_v63  ;;  %v494_v35 = vrot.slane %v493_v21, 1 }
 0x1ec   :  { %v531_v48 = vsel %vm61_vm0, %v487_v38, 0.0  ;;  %v779_v38 = vpop.eup %778  ;;  %v523_v53 = vadd.f32 %v522_v27, %v521_v25 }
 0x1ed   :  { %v532_v51 = vrot.slane %v531_v48, 4  ;;  %v589_v52 = vadd.f32 %v588_v44, %v587_v39  ;;  %v586_v17 = vadd.f32 %v585_v1, %v584_v50  ;;  %v502_v39 = vadd.f32 %v501_v29, %v500_v57  ;;  %v781_v42 = vpop.eup %780 }
 0x1ee   :  { %v529_v40 = vrot.slane %v528_v31, 1  ;;  %v509_v44 = vadd.f32 %v508_v30, %v507_v14  ;;  %v783_v47 = vpop.eup %782  ;;  %v516_v50 = vadd.f32 %v515_v36, %v514_v22 }
 0x1ef   :  { %v590_v60 = vrot.slane %v589_v52, 2  ;;  %v533_v2 = vadd.f32 %v532_v51, %v531_v48  ;;  %784 = vrcp.f32 %v586_v17  ;;  %v495_v48 = vadd.f32 %v494_v35, %v493_v21 }
 0x1f0   :  { %v610_v49 = vmul.f32 %v777_v24, %v502_v39  ;;  %v612_v56 = vmul.f32 %v781_v42, %v516_v50  ;;  %v530_v57 = vadd.f32 %v529_v40, %v528_v31  ;;  %v613_v59 = vmul.f32 %v783_v47, %v523_v53 }
 0x1f1   :  { %v591_v3 = vadd.f32 %v590_v60, %v589_v52  ;;  %v478_v4 = vpop.f32.mrf.mxu0  ;;  %v534_v18 = vrot.slane %v533_v2, 2  ;;  %v611_v52 = vmul.f32 %v779_v38, %v509_v44  ;;  %v609_v55 = vmul.f32 %v775_v13, %v495_v48 }
 0x1f2   :  { %v488_v7 = vmul.f32 %v478_v4, %v254_v0  ;;  %v594_v8 = vsel %vm61_vm0, %v478_v4, 0.0 }
 0x1f3   :  { %v592_v11 = vrot.slane %v591_v3, 1  ;;  %v595_v12 = vrot.slane %v594_v8, 4  ;;  %v535_v32 = vadd.f32 %v534_v18, %v533_v2  ;;  %v626_v61 = vsel %vm625_vm3, %v610_v49, %v609_v55 }
 0x1f4   :  { %v538_v43 = vsel %vm61_vm0, %v488_v7, 0.0  ;;  %v628_v63 = vsel %vm627_vm4, %v611_v52, %v626_v61 }
 0x1f5   :  { %v539_v19 = vrot.slane %v538_v43, 4  ;;  %v596_v20 = vadd.f32 %v595_v12, %v594_v8  ;;  %v593_v23 = vadd.f32 %v592_v11, %v591_v3  ;;  %v536_v45 = vrot.slane %v535_v32, 1  ;;  %v785_v51 = vpop.eup %784 }
 0x1f6   :  { %v614_v62 = vmul.f32 %v785_v51, %v530_v57  ;;  %v630_v2 = vsel %vm629_vm5, %v612_v56, %v628_v63 }
 0x1f7   :  { %v540_v26 = vadd.f32 %v539_v19, %v538_v43  ;;  %v597_v28 = vrot.slane %v596_v20, 2  ;;  %786 = vrcp.f32 %v593_v23  ;;  %v537_v60 = vadd.f32 %v536_v45, %v535_v32 }
 0x1f8   :  { %v632_v4 = vsel %vm631_vm6, %v613_v59, %v630_v2 }
 0x1f9   :  { %v541_v33 = vrot.slane %v540_v26, 2  ;;  %v598_v34 = vadd.f32 %v597_v28, %v596_v20  ;;  %v634_v6 = vsel %vm633_vm7, %v614_v62, %v632_v4 }
 0x1fb   :  { %v599_v37 = vrot.slane %v598_v34, 1  ;;  %v542_v41 = vadd.f32 %v541_v33, %v540_v26 }
 0x1fd   :  { %v600_v46 = vadd.f32 %v599_v37, %v598_v34  ;;  %v787_v54 = vpop.eup %786  ;;  %v543_v58 = vrot.slane %v542_v41, 1 }
 0x1fe   :  { %v615_v0 = vmul.f32 %v787_v54, %v537_v60 }
 0x1ff   :  { %788 = vrcp.f32 %v600_v46  ;;  %v544_v1 = vadd.f32 %v543_v58, %v542_v41 }
 0x200   :  { %v636_v7 = vsel %vm635_vm8, %v615_v0, %v634_v6 }
 0x205   :  { %v789_v3 = vpop.eup %788 }
 0x206   :  { %v616_v5 = vmul.f32 %v789_v3, %v544_v1 }
 0x208   :  { %v638_v8 = vsel %vm637_vm9, %v616_v5, %v636_v7 }
 0x209   :  { %640 = vst.msk [vmem:[#allocation2] sm:$0xff] %vm61_vm0, %v638_v8 }
 0x20a   :  { %651 = dma.vmem_to_hbm [thread:$0]  %s647_s29, 128, %s649_s12, [#allocation3]  }
 0x20b   :  { %814 = dma.done.wait [#allocation3], 128  }
 0x20c   :  { %815 = vsyncadd [#allocation3], 4294967168 }
 0x20d   :  { %656 = vsyncpa [#allocation3], 1 }

// kernel: tpu_custom_call.1
= control target key start
LH: loop header
LB: loop body
LE: loop exit
PB: predicated region body
PF: predicated region fallthrough
CT: control target
= control target key end

     0   :  { %s995_s0 = inlined_call_operand.vmem [shape: bf16[8,32], index: 0, kind: input, shape index: {}]   ;;  %s996_s1 = inlined_call_operand.vmem [shape: bf16[64,32], index: 1, kind: input, shape index: {}]   ;;  %s997_s2 = inlined_call_operand.vmem [shape: bf16[64,32], index: 2, kind: input, shape index: {}]   ;;  %s998_s3 = inlined_call_operand.vmem [shape: bf16[32,32], index: 3, kind: input, shape index: {}]   ;;  %s999_s4 = inlined_call_operand.vmem [shape: f32[1,32], index: 4, kind: input, shape index: {}]   ;;  %s1000_s5 = inlined_call_operand.vmem [shape: bf16[32,32], index: 5, kind: input, shape index: {}]   ;;  %s1001_s6 = inlined_call_operand.vmem [shape: f32[1,32], index: 6, kind: input, shape index: {}]   ;;  %s1002_s7 = inlined_call_operand.vmem [shape: bf16[32,32], index: 7, kind: input, shape index: {}]   ;;  %s1003_s8 = inlined_call_operand.vmem [shape: f32[1,32], index: 8, kind: input, shape index: {}]   ;;  %s1004_s9 = inlined_call_operand.vmem [shape: bf16[32,4], index: 9, kind: input, shape index: {}]   ;;  %s1005_s10 = inlined_call_operand.vmem [shape: bf16[4,32], index: 10, kind: input, shape index: {}]   ;;  %s1006_s11 = inlined_call_operand.hbm [shape: f32[8,32], index: 11, kind: output, shape index: {}]  }
   0x1   :  { %v739_v0 = vld [vmem:[%s998_s3 + $0x8] sm:$0xff]  ;;  %v738_v2 = vld [vmem:[%s998_s3] sm:$0xff] }
   0x2   :  { %v745_v1 = vld [vmem:[%s1000_s5 + $0x8] sm:$0xff]  ;;  %71 = vmatpush.bf16.msra.mxu0 %v739_v0  ;;  %v744_v3 = vld [vmem:[%s1000_s5] sm:$0xff] }
   0x3   :  { %144 = vmatpush.bf16.msra.mxu1 %v745_v1 }
   0x4   :  { %16 = vsyncpa [#allocation3], 0  ;;  %v740_v4 = vld [vmem:[%s996_s1] sm:$0xff]  ;;  %vm61_vm0 = vcmask 261120   ;;  %v741_v6 = vld [vmem:[%s996_s1 + $0x8] sm:$0xff]  ;;  %vm350_vm1 = vcmask 31744  }
   0x5   :  { %v40_v5 = vld [vmem:[%s995_s0] sm:$0xf]  ;;  %v742_v7 = vld [vmem:[%s996_s1 + $0x10] sm:$0xff]  ;;  %v743_v8 = vld [vmem:[%s996_s1 + $0x18] sm:$0xff]  ;;  %vm448_vm2 = vcmask 1041408   ;;  %vm625_vm3 = vcmask 1041409  }
   0x6   :  { %72 = vmatpush.bf16.msra.mxu0 %v738_v2  ;;  %v753_v9 = vld [vmem:[%s1004_s9 + $0x8] sm:$0xff]  ;;  %v752_v10 = vld [vmem:[%s1004_s9] sm:$0xff]  ;;  %vm627_vm4 = vcmask 1042434   ;;  %vm629_vm5 = vcmask 1043459   ;;  %vm631_vm6 = vcmask 1044484   ;;  %vm633_vm7 = vcmask 1045509  }
   0x7   :  { %145 = vmatpush.bf16.msra.mxu1 %v744_v3  ;;  %327 = vmatpush.bf16.msra.mxu3 %v753_v9  ;;  %v755_v11 = vld [vmem:[%s999_s4] ss:$0 sm:$0xff]  ;;  %v751_v60 = vld [vmem:[%s1002_s7 + $0x8] sm:$0xff]  ;;  %vm635_vm8 = vcmask 1046534   ;;  %s648_s12 = sshll.u32 %s1006_s11, 4  ;;  %vm637_vm9 = vcmask 1047559   ;;  %s649_s12 = int_to_ptr.hbm [resolvable:$true] %s648_s12 }
   0x8   :  { %v756_v16 = vld [vmem:[%s1001_s6] ss:$0 sm:$0xff]  ;;  %233 = vmatpush.bf16.msra.mxu2 %v751_v60 }
   0x9   :  { %665 = vmatmul.msk.bf16.vlgmr.msra.gmra.mxu0 %vm61_vm0, %v40_v5  ;;  %v750_v61 = vld [vmem:[%s1002_s7] sm:$0xff] }
   0xa   :  { %690 = vmatmul.msk.bf16.vlgmr.msra.gmra.mxu1 %vm61_vm0, %v740_v4  ;;  %v746_v62 = vld [vmem:[%s997_s2] sm:$0xff] }
   0xb   :  { %328 = vmatpush.bf16.msra.mxu3 %v752_v10  ;;  %v435_v63 = vld [vmem:[%s1005_s10] sm:$0x3] }
   0xc   :  { %234 = vmatpush.bf16.msra.mxu2 %v750_v61  ;;  %v450_v0 = vsel %vm448_vm2, %v435_v63, 0 }
   0xd   :  { %459 = vmatpush.bf16.msrb.mxu0 %v450_v0 }
   0xf   :  { %718 = vmatmul.msk.bf16.vlgmr.msra.gmra.mxu2 %vm61_vm0, %v746_v62 }
  0x1a   :  { %691 = vmatmul.msk.bf16.gmra.mxu1 %vm61_vm0, %v741_v6  ;;  %v747_v6 = vld [vmem:[%s997_s2 + $0x8] sm:$0xff] }
  0x1f   :  { %719 = vmatmul.msk.bf16.gmra.mxu2 %vm61_vm0, %v747_v6 }
  0x2a   :  { %692 = vmatmul.msk.bf16.gmra.mxu1 %vm61_vm0, %v742_v7 }
  0x3a   :  { %693 = vmatmul.msk.bf16.gmra.mxu1 %vm61_vm0, %v743_v8 }
  0x86   :  { %v74_v12 = vpop.f32.mrf.mxu0 }
  0x87   :  { %v147_v13 = vpop.f32.mrf.mxu1  ;;  %v75_v14 = vadd.f32 %v755_v11, %v74_v12 }
  0x88   :  { %v148_v22 = vadd.f32 %v756_v16, %v147_v13 }
  0x89   :  { %v256_v15 = vmul.f32 0.35355338, %v75_v14 }
  0x8b   :  { %v258_v17 = vrot.slane %v256_v15, 1  ;;  %v265_v18 = vperm.slane %v256_v15, 0  ;;  %v259_v28 = vrot.slane %v256_v15, 2  ;;  %v260_v29 = vrot.slane %v256_v15, 3 }
  0x8c   :  { %v261_v39 = vrot.slane %v256_v15, 4  ;;  %v262_v40 = vrot.slane %v256_v15, 5  ;;  %v263_v50 = vrot.slane %v256_v15, 6  ;;  %v264_v51 = vrot.slane %v256_v15, 7 }
  0x8d   :  { %v266_v19 = vperm.slane %v258_v17, 0  ;;  %v281_v24 = vmul.f32 %v265_v18, %v148_v22  ;;  %v267_v32 = vperm.slane %v259_v28, 0  ;;  %v268_v34 = vperm.slane %v260_v29, 0 }
  0x8e   :  { %v76_v20 = vpop.f32.mrf.mxu0  ;;  %v269_v43 = vperm.slane %v261_v39, 0  ;;  %v270_v45 = vperm.slane %v262_v40, 0  ;;  %v271_v54 = vperm.slane %v263_v50, 0  ;;  %v272_v56 = vperm.slane %v264_v51, 0  ;;  %v749_v50 = vld [vmem:[%s997_s2 + $0x18] sm:$0xff] }
  0x8f   :  { %v149_v21 = vpop.f32.mrf.mxu1 }
  0x90   :  { %v150_v23 = vadd.f32 %v756_v16, %v149_v21 }
  0x92   :  { %v282_v25 = vmul.f32 %v266_v19, %v150_v23 }
  0x94   :  { %v289_v26 = vpack.c.bf16 %v282_v25, %v281_v24 }
  0x96   :  { %730 = vmatmul.msk.bf16.vlgmr.msra.gmra.mxu3 %vm61_vm0, %v289_v26  ;;  %v748_v26 = vld [vmem:[%s997_s2 + $0x10] sm:$0xff] }
  0x97   :  { %v152_v27 = vpop.f32.mrf.mxu1  ;;  %720 = vmatmul.msk.bf16.gmra.mxu2 %vm61_vm0, %v748_v26 }
  0x98   :  { %v153_v30 = vadd.f32 %v756_v16, %v152_v27 }
  0x9a   :  { %v283_v35 = vmul.f32 %v267_v32, %v153_v30 }
  0x9f   :  { %v154_v31 = vpop.f32.mrf.mxu1 }
  0xa0   :  { %v155_v33 = vadd.f32 %v756_v16, %v154_v31 }
  0xa2   :  { %v284_v36 = vmul.f32 %v268_v34, %v155_v33 }
  0xa4   :  { %v290_v37 = vpack.c.bf16 %v284_v36, %v283_v35 }
  0xa6   :  { %731 = vmatmul.msk.bf16.gmra.mxu3 %vm61_vm0, %v290_v37 }
  0xa7   :  { %v157_v38 = vpop.f32.mrf.mxu1  ;;  %721 = vmatmul.msk.bf16.gmra.mxu2 %vm61_vm0, %v749_v50 }
  0xa8   :  { %v158_v41 = vadd.f32 %v756_v16, %v157_v38 }
  0xaa   :  { %v285_v46 = vmul.f32 %v269_v43, %v158_v41 }
  0xaf   :  { %v159_v42 = vpop.f32.mrf.mxu1 }
  0xb0   :  { %v160_v44 = vadd.f32 %v756_v16, %v159_v42 }
  0xb2   :  { %v286_v47 = vmul.f32 %v270_v45, %v160_v44 }
  0xb4   :  { %v291_v48 = vpack.c.bf16 %v286_v47, %v285_v46 }
  0xb6   :  { %732 = vmatmul.msk.bf16.gmra.mxu3 %vm61_vm0, %v291_v48 }
  0xb7   :  { %v162_v49 = vpop.f32.mrf.mxu1 }
  0xb8   :  { %v163_v52 = vadd.f32 %v756_v16, %v162_v49 }
  0xba   :  { %v287_v57 = vmul.f32 %v271_v54, %v163_v52 }
  0xbf   :  { %v164_v53 = vpop.f32.mrf.mxu1 }
  0xc0   :  { %v165_v55 = vadd.f32 %v756_v16, %v164_v53 }
  0xc2   :  { %v288_v58 = vmul.f32 %v272_v56, %v165_v55 }
  0xc4   :  { %v292_v59 = vpack.c.bf16 %v288_v58, %v287_v57 }
  0xc6   :  { %733 = vmatmul.msk.bf16.gmra.mxu3 %vm61_vm0, %v292_v59 }
 0x119   :  { %v330_v1 = vpop.f32.mrf.mxu3 }
 0x11a   :  { %v351_v2 = vsel %vm350_vm1, %v330_v1, -inf }
 0x11b   :  { %v352_v3 = vrot.slane %v351_v2, 4 }
 0x11d   :  { %v353_v4 = vmax.f32 %v351_v2, %v352_v3 }
 0x11f   :  { %v354_v5 = vrot.slane %v353_v4, 2 }
 0x121   :  { %v355_v7 = vmax.f32 %v353_v4, %v354_v5  ;;  %v332_v8 = vpop.f32.mrf.mxu3 }
 0x122   :  { %v358_v9 = vsel %vm350_vm1, %v332_v8, -inf }
 0x123   :  { %v356_v10 = vrot.slane %v355_v7, 1  ;;  %v359_v11 = vrot.slane %v358_v9, 4 }
 0x125   :  { %v360_v12 = vmax.f32 %v358_v9, %v359_v11  ;;  %v357_v13 = vmax.f32 %v355_v7, %v356_v10 }
 0x127   :  { %v361_v14 = vrot.slane %v360_v12, 2  ;;  %v407_v17 = vsub.f32 %v330_v1, %v357_v13 }
 0x129   :  { %v362_v15 = vmax.f32 %v360_v12, %v361_v14  ;;  %v335_v16 = vpop.f32.mrf.mxu3  ;;  %v415_v23 = vmul.f32 1.442695, %v407_v17 }
 0x12a   :  { %v365_v18 = vsel %vm350_vm1, %v335_v16, -inf }
 0x12b   :  { %v363_v19 = vrot.slane %v362_v15, 1  ;;  %v366_v20 = vrot.slane %v365_v18, 4  ;;  %758 = vpow2.f32 %v415_v23 }
 0x12d   :  { %v364_v21 = vmax.f32 %v362_v15, %v363_v19  ;;  %v367_v22 = vmax.f32 %v365_v18, %v366_v20 }
 0x12f   :  { %v408_v24 = vsub.f32 %v332_v8, %v364_v21  ;;  %v368_v25 = vrot.slane %v367_v22, 2 }
 0x131   :  { %v417_v27 = vmul.f32 1.442695, %v408_v24  ;;  %v369_v28 = vmax.f32 %v367_v22, %v368_v25  ;;  %v337_v29 = vpop.f32.mrf.mxu3  ;;  %v759_v36 = vpop.eup %758 }
 0x132   :  { %v372_v30 = vsel %vm350_vm1, %v337_v29, -inf }
 0x133   :  { %760 = vpow2.f32 %v417_v27  ;;  %v370_v31 = vrot.slane %v369_v28, 1  ;;  %v373_v32 = vrot.slane %v372_v30, 4 }
 0x135   :  { %v374_v33 = vmax.f32 %v372_v30, %v373_v32  ;;  %v371_v34 = vmax.f32 %v369_v28, %v370_v31  ;;  %v236_v32 = vpop.f32.mrf.mxu2 }
 0x137   :  { %v375_v35 = vrot.slane %v374_v33, 2  ;;  %v409_v40 = vsub.f32 %v335_v16, %v371_v34 }
 0x139   :  { %v761_v37 = vpop.eup %760  ;;  %v376_v38 = vmax.f32 %v374_v33, %v375_v35  ;;  %v340_v39 = vpop.f32.mrf.mxu3  ;;  %v419_v47 = vmul.f32 1.442695, %v409_v40 }
 0x13a   :  { %v379_v41 = vsel %vm350_vm1, %v340_v39, -inf  ;;  %v431_v42 = vpack.c.bf16 %v761_v37, %v759_v36 }
 0x13b   :  { %v377_v43 = vrot.slane %v376_v38, 1  ;;  %v380_v44 = vrot.slane %v379_v41, 4  ;;  %762 = vpow2.f32 %v419_v47 }
 0x13c   :  { %734 = vmatmul.msk.bf16.vlgmr.msrb.gmra.mxu0 %vm350_vm1, %v431_v42 }
 0x13d   :  { %v378_v45 = vmax.f32 %v376_v38, %v377_v43  ;;  %v381_v46 = vmax.f32 %v379_v41, %v380_v44  ;;  %v238_v33 = vpop.f32.mrf.mxu2  ;;  %v966_v43 = vld [vmem:[%s1003_s8] ss:$0 sm:$0xff]  ;;  %s816_s8 = smov [#allocation2]  }
 0x13e   :  { %v239_v50 = vadd.f32 %v966_v43, %v238_v33  ;;  %s646_s29 = sshll.u32 %s816_s8, 4  ;;  %s647_s29 = int_to_ptr.vmem [resolvable:$true] %s646_s29 }
 0x13f   :  { %v410_v48 = vsub.f32 %v337_v29, %v378_v45  ;;  %v382_v49 = vrot.slane %v381_v46, 2 }
 0x141   :  { %v421_v51 = vmul.f32 1.442695, %v410_v48  ;;  %v383_v52 = vmax.f32 %v381_v46, %v382_v49  ;;  %v342_v53 = vpop.f32.mrf.mxu3  ;;  %v763_v60 = vpop.eup %762  ;;  %v237_v46 = vadd.f32 %v966_v43, %v236_v32 }
 0x142   :  { %v386_v54 = vsel %vm350_vm1, %v342_v53, -inf }
 0x143   :  { %764 = vpow2.f32 %v421_v51  ;;  %v384_v55 = vrot.slane %v383_v52, 1  ;;  %v387_v56 = vrot.slane %v386_v54, 4 }
 0x145   :  { %v388_v57 = vmax.f32 %v386_v54, %v387_v56  ;;  %v385_v58 = vmax.f32 %v383_v52, %v384_v55  ;;  %v241_v35 = vpop.f32.mrf.mxu2 }
 0x147   :  { %v389_v59 = vrot.slane %v388_v57, 2  ;;  %v411_v0 = vsub.f32 %v340_v39, %v385_v58 }
 0x149   :  { %v765_v61 = vpop.eup %764  ;;  %v390_v62 = vmax.f32 %v388_v57, %v389_v59  ;;  %v345_v63 = vpop.f32.mrf.mxu3  ;;  %v423_v7 = vmul.f32 1.442695, %v411_v0  ;;  %v242_v57 = vadd.f32 %v966_v43, %v241_v35 }
 0x14a   :  { %v393_v1 = vsel %vm350_vm1, %v345_v63, -inf  ;;  %v432_v2 = vpack.c.bf16 %v765_v61, %v763_v60 }
 0x14b   :  { %v391_v3 = vrot.slane %v390_v62, 1  ;;  %v394_v4 = vrot.slane %v393_v1, 4  ;;  %766 = vpow2.f32 %v423_v7 }
 0x14c   :  { %735 = vmatmul.msk.bf16.gmra.mxu0 %vm350_vm1, %v432_v2 }
 0x14d   :  { %v392_v5 = vmax.f32 %v390_v62, %v391_v3  ;;  %v395_v6 = vmax.f32 %v393_v1, %v394_v4  ;;  %v243_v37 = vpop.f32.mrf.mxu2 }
 0x14e   :  { %v244_v4 = vadd.f32 %v966_v43, %v243_v37 }
 0x14f   :  { %v412_v8 = vsub.f32 %v342_v53, %v392_v5  ;;  %v396_v9 = vrot.slane %v395_v6, 2 }
 0x151   :  { %v425_v10 = vmul.f32 1.442695, %v412_v8  ;;  %v397_v11 = vmax.f32 %v395_v6, %v396_v9  ;;  %v347_v12 = vpop.f32.mrf.mxu3  ;;  %v767_v19 = vpop.eup %766 }
 0x152   :  { %v400_v13 = vsel %vm350_vm1, %v347_v12, -inf }
 0x153   :  { %768 = vpow2.f32 %v425_v10  ;;  %v398_v14 = vrot.slane %v397_v11, 1  ;;  %v401_v15 = vrot.slane %v400_v13, 4 }
 0x155   :  { %v402_v16 = vmax.f32 %v400_v13, %v401_v15  ;;  %v399_v17 = vmax.f32 %v397_v11, %v398_v14  ;;  %v246_v39 = vpop.f32.mrf.mxu2 }
 0x157   :  { %v403_v18 = vrot.slane %v402_v16, 2  ;;  %v413_v22 = vsub.f32 %v345_v63, %v399_v17  ;;  %v247_v63 = vadd.f32 %v966_v43, %v246_v39 }
 0x159   :  { %v769_v20 = vpop.eup %768  ;;  %v404_v21 = vmax.f32 %v402_v16, %v403_v18  ;;  %v427_v26 = vmul.f32 1.442695, %v413_v22 }
 0x15a   :  { %v433_v23 = vpack.c.bf16 %v769_v20, %v767_v19 }
 0x15b   :  { %v405_v24 = vrot.slane %v404_v21, 1  ;;  %770 = vpow2.f32 %v427_v26 }
 0x15c   :  { %736 = vmatmul.msk.bf16.gmra.mxu0 %vm350_vm1, %v433_v23 }
 0x15d   :  { %v406_v25 = vmax.f32 %v404_v21, %v405_v24  ;;  %v248_v49 = vpop.f32.mrf.mxu2 }
 0x15e   :  { %v249_v7 = vadd.f32 %v966_v43, %v248_v49 }
 0x15f   :  { %v414_v27 = vsub.f32 %v347_v12, %v406_v25 }
 0x161   :  { %v429_v28 = vmul.f32 1.442695, %v414_v27  ;;  %v771_v29 = vpop.eup %770 }
 0x163   :  { %772 = vpow2.f32 %v429_v28 }
 0x165   :  { %v251_v13 = vpop.f32.mrf.mxu2 }
 0x166   :  { %v252_v23 = vadd.f32 %v966_v43, %v251_v13 }
 0x169   :  { %v773_v30 = vpop.eup %772 }
 0x16a   :  { %v434_v31 = vpack.c.bf16 %v773_v30, %v771_v29 }
 0x16c   :  { %737 = vmatmul.msk.bf16.gmra.mxu0 %vm350_vm1, %v434_v31 }
 0x1b9   :  { %v461_v34 = vpop.f32.mrf.mxu0 }
 0x1ba   :  { %v545_v40 = vsel %vm61_vm0, %v461_v34, 0.0  ;;  %v481_v55 = vmul.f32 %v461_v34, %v237_v46 }
 0x1bb   :  { %v546_v42 = vrot.slane %v545_v40, 4 }
 0x1bc   :  { %v489_v1 = vsel %vm61_vm0, %v481_v55, 0.0 }
 0x1bd   :  { %v547_v45 = vadd.f32 %v546_v42, %v545_v40  ;;  %v490_v14 = vrot.slane %v489_v1, 4 }
 0x1bf   :  { %v548_v52 = vrot.slane %v547_v45, 2  ;;  %v491_v27 = vadd.f32 %v490_v14, %v489_v1 }
 0x1c1   :  { %v463_v36 = vpop.f32.mrf.mxu0  ;;  %v549_v61 = vadd.f32 %v548_v52, %v547_v45 }
 0x1c2   :  { %v552_v44 = vsel %vm61_vm0, %v463_v36, 0.0  ;;  %v482_v53 = vmul.f32 %v463_v36, %v239_v50 }
 0x1c3   :  { %v553_v47 = vrot.slane %v552_v44, 4  ;;  %v550_v15 = vrot.slane %v549_v61, 1 }
 0x1c4   :  { %v496_v62 = vsel %vm61_vm0, %v482_v53, 0.0  ;;  %v253_v53 = vpop.f32.mrf.mxu2 }
 0x1c5   :  { %v554_v56 = vadd.f32 %v553_v47, %v552_v44  ;;  %v497_v9 = vrot.slane %v496_v62, 4  ;;  %v551_v31 = vadd.f32 %v550_v15, %v549_v61 }
 0x1c7   :  { %v555_v2 = vrot.slane %v554_v56, 2  ;;  %v498_v24 = vadd.f32 %v497_v9, %v496_v62  ;;  %774 = vrcp.f32 %v551_v31 }
 0x1c9   :  { %v466_v38 = vpop.f32.mrf.mxu0  ;;  %v556_v18 = vadd.f32 %v555_v2, %v554_v56  ;;  %v499_v40 = vrot.slane %v498_v24, 2 }
 0x1ca   :  { %v559_v51 = vsel %vm61_vm0, %v466_v38, 0.0  ;;  %v483_v3 = vmul.f32 %v466_v38, %v242_v57 }
 0x1cb   :  { %v560_v59 = vrot.slane %v559_v51, 4  ;;  %v557_v32 = vrot.slane %v556_v18, 1  ;;  %v500_v57 = vadd.f32 %v499_v40, %v498_v24 }
 0x1cc   :  { %v503_v19 = vsel %vm61_vm0, %v483_v3, 0.0 }
 0x1cd   :  { %v561_v6 = vadd.f32 %v560_v59, %v559_v51  ;;  %v504_v28 = vrot.slane %v503_v19, 4  ;;  %v558_v49 = vadd.f32 %v557_v32, %v556_v18  ;;  %v775_v13 = vpop.eup %774 }
 0x1cf   :  { %v562_v22 = vrot.slane %v561_v6, 2  ;;  %v505_v45 = vadd.f32 %v504_v28, %v503_v19  ;;  %776 = vrcp.f32 %v558_v49 }
 0x1d1   :  { %v468_v41 = vpop.f32.mrf.mxu0  ;;  %v563_v36 = vadd.f32 %v562_v22, %v561_v6  ;;  %v506_v61 = vrot.slane %v505_v45, 2 }
 0x1d2   :  { %v566_v54 = vsel %vm61_vm0, %v468_v41, 0.0  ;;  %v484_v10 = vmul.f32 %v468_v41, %v244_v4 }
 0x1d3   :  { %v567_v60 = vrot.slane %v566_v54, 4  ;;  %v564_v55 = vrot.slane %v563_v36, 1  ;;  %v507_v14 = vadd.f32 %v506_v61, %v505_v45 }
 0x1d4   :  { %v510_v25 = vsel %vm61_vm0, %v484_v10, 0.0 }
 0x1d5   :  { %v568_v11 = vadd.f32 %v567_v60, %v566_v54  ;;  %v511_v37 = vrot.slane %v510_v25, 4  ;;  %v492_v54 = vrot.slane %v491_v27, 2  ;;  %v777_v24 = vpop.eup %776 }
 0x1d7   :  { %v569_v26 = vrot.slane %v568_v11, 2  ;;  %v512_v56 = vadd.f32 %v511_v37, %v510_v25 }
 0x1d9   :  { %v471_v48 = vpop.f32.mrf.mxu0  ;;  %v570_v41 = vadd.f32 %v569_v26, %v568_v11  ;;  %v513_v6 = vrot.slane %v512_v56, 2 }
 0x1da   :  { %v573_v58 = vsel %vm61_vm0, %v471_v48, 0.0  ;;  %v485_v16 = vmul.f32 %v471_v48, %v247_v63 }
 0x1db   :  { %v574_v0 = vrot.slane %v573_v58, 4  ;;  %v514_v22 = vadd.f32 %v513_v6, %v512_v56 }
 0x1dc   :  { %v517_v29 = vsel %vm61_vm0, %v485_v16, 0.0 }
 0x1dd   :  { %v575_v17 = vadd.f32 %v574_v0, %v573_v58  ;;  %v518_v42 = vrot.slane %v517_v29, 4  ;;  %v571_v58 = vrot.slane %v570_v41, 1  ;;  %v254_v0 = vadd.f32 %v966_v43, %v253_v53 }
 0x1df   :  { %v576_v30 = vrot.slane %v575_v17, 2  ;;  %v519_v59 = vadd.f32 %v518_v42, %v517_v29  ;;  %v572_v9 = vadd.f32 %v571_v58, %v570_v41  ;;  %v501_v29 = vrot.slane %v500_v57, 1 }
 0x1e1   :  { %v473_v5 = vpop.f32.mrf.mxu0  ;;  %v577_v46 = vadd.f32 %v576_v30, %v575_v17  ;;  %v520_v10 = vrot.slane %v519_v59, 2  ;;  %v508_v30 = vrot.slane %v507_v14, 1 }
 0x1e2   :  { %v580_v8 = vsel %vm61_vm0, %v473_v5, 0.0  ;;  %v486_v20 = vmul.f32 %v473_v5, %v249_v7  ;;  %v565_v5 = vadd.f32 %v564_v55, %v563_v36  ;;  %v515_v36 = vrot.slane %v514_v22, 1 }
 0x1e3   :  { %v581_v12 = vrot.slane %v580_v8, 4  ;;  %v578_v62 = vrot.slane %v577_v46, 1  ;;  %v521_v25 = vadd.f32 %v520_v10, %v519_v59 }
 0x1e4   :  { %v524_v33 = vsel %vm61_vm0, %v486_v20, 0.0  ;;  %778 = vrcp.f32 %v565_v5 }
 0x1e5   :  { %v582_v21 = vadd.f32 %v581_v12, %v580_v8  ;;  %v525_v47 = vrot.slane %v524_v33, 4  ;;  %v579_v15 = vadd.f32 %v578_v62, %v577_v46  ;;  %780 = vrcp.f32 %v572_v9 }
 0x1e7   :  { %v583_v34 = vrot.slane %v582_v21, 2  ;;  %v526_v63 = vadd.f32 %v525_v47, %v524_v33  ;;  %782 = vrcp.f32 %v579_v15 }
 0x1e9   :  { %v476_v35 = vpop.f32.mrf.mxu0  ;;  %v584_v50 = vadd.f32 %v583_v34, %v582_v21  ;;  %v527_v16 = vrot.slane %v526_v63, 2  ;;  %v493_v21 = vadd.f32 %v492_v54, %v491_v27  ;;  %v522_v27 = vrot.slane %v521_v25, 1 }
 0x1ea   :  { %v487_v38 = vmul.f32 %v476_v35, %v252_v23  ;;  %v587_v39 = vsel %vm61_vm0, %v476_v35, 0.0 }
 0x1eb   :  { %v588_v44 = vrot.slane %v587_v39, 4  ;;  %v585_v1 = vrot.slane %v584_v50, 1  ;;  %v528_v31 = vadd.f32 %v527_v16, %v526_v63  ;;  %v494_v35 = vrot.slane %v493_v21, 1 }
 0x1ec   :  { %v531_v48 = vsel %vm61_vm0, %v487_v38, 0.0  ;;  %v779_v38 = vpop.eup %778  ;;  %v523_v53 = vadd.f32 %v522_v27, %v521_v25 }
 0x1ed   :  { %v532_v51 = vrot.slane %v531_v48, 4  ;;  %v589_v52 = vadd.f32 %v588_v44, %v587_v39  ;;  %v586_v17 = vadd.f32 %v585_v1, %v584_v50  ;;  %v502_v39 = vadd.f32 %v501_v29, %v500_v57  ;;  %v781_v42 = vpop.eup %780 }
 0x1ee   :  { %v529_v40 = vrot.slane %v528_v31, 1  ;;  %v509_v44 = vadd.f32 %v508_v30, %v507_v14  ;;  %v783_v47 = vpop.eup %782  ;;  %v516_v50 = vadd.f32 %v515_v36, %v514_v22 }
 0x1ef   :  { %v590_v60 = vrot.slane %v589_v52, 2  ;;  %v533_v2 = vadd.f32 %v532_v51, %v531_v48  ;;  %784 = vrcp.f32 %v586_v17  ;;  %v495_v48 = vadd.f32 %v494_v35, %v493_v21 }
 0x1f0   :  { %v610_v49 = vmul.f32 %v777_v24, %v502_v39  ;;  %v612_v56 = vmul.f32 %v781_v42, %v516_v50  ;;  %v530_v57 = vadd.f32 %v529_v40, %v528_v31  ;;  %v613_v59 = vmul.f32 %v783_v47, %v523_v53 }
 0x1f1   :  { %v591_v3 = vadd.f32 %v590_v60, %v589_v52  ;;  %v478_v4 = vpop.f32.mrf.mxu0  ;;  %v534_v18 = vrot.slane %v533_v2, 2  ;;  %v611_v52 = vmul.f32 %v779_v38, %v509_v44  ;;  %v609_v55 = vmul.f32 %v775_v13, %v495_v48 }
 0x1f2   :  { %v488_v7 = vmul.f32 %v478_v4, %v254_v0  ;;  %v594_v8 = vsel %vm61_vm0, %v478_v4, 0.0 }
 0x1f3   :  { %v592_v11 = vrot.slane %v591_v3, 1  ;;  %v595_v12 = vrot.slane %v594_v8, 4  ;;  %v535_v32 = vadd.f32 %v534_v18, %v533_v2  ;;  %v626_v61 = vsel %vm625_vm3, %v610_v49, %v609_v55 }
 0x1f4   :  { %v538_v43 = vsel %vm61_vm0, %v488_v7, 0.0  ;;  %v628_v63 = vsel %vm627_vm4, %v611_v52, %v626_v61 }
 0x1f5   :  { %v539_v19 = vrot.slane %v538_v43, 4  ;;  %v596_v20 = vadd.f32 %v595_v12, %v594_v8  ;;  %v593_v23 = vadd.f32 %v592_v11, %v591_v3  ;;  %v536_v45 = vrot.slane %v535_v32, 1  ;;  %v785_v51 = vpop.eup %784 }
 0x1f6   :  { %v614_v62 = vmul.f32 %v785_v51, %v530_v57  ;;  %v630_v2 = vsel %vm629_vm5, %v612_v56, %v628_v63 }
 0x1f7   :  { %v540_v26 = vadd.f32 %v539_v19, %v538_v43  ;;  %v597_v28 = vrot.slane %v596_v20, 2  ;;  %786 = vrcp.f32 %v593_v23  ;;  %v537_v60 = vadd.f32 %v536_v45, %v535_v32 }
 0x1f8   :  { %v632_v4 = vsel %vm631_vm6, %v613_v59, %v630_v2 }
 0x1f9   :  { %v541_v33 = vrot.slane %v540_v26, 2  ;;  %v598_v34 = vadd.f32 %v597_v28, %v596_v20  ;;  %v634_v6 = vsel %vm633_vm7, %v614_v62, %v632_v4 }
 0x1fb   :  { %v599_v37 = vrot.slane %v598_v34, 1  ;;  %v542_v41 = vadd.f32 %v541_v33, %v540_v26 }
 0x1fd   :  { %v600_v46 = vadd.f32 %v599_v37, %v598_v34  ;;  %v787_v54 = vpop.eup %786  ;;  %v543_v58 = vrot.slane %v542_v41, 1 }
 0x1fe   :  { %v615_v0 = vmul.f32 %v787_v54, %v537_v60 }
 0x1ff   :  { %788 = vrcp.f32 %v600_v46  ;;  %v544_v1 = vadd.f32 %v543_v58, %v542_v41 }
 0x200   :  { %v636_v7 = vsel %vm635_vm8, %v615_v0, %v634_v6 }
 0x205   :  { %v789_v3 = vpop.eup %788 }
 0x206   :  { %v616_v5 = vmul.f32 %v789_v3, %v544_v1 }
 0x208   :  { %v638_v8 = vsel %vm637_vm9, %v616_v5, %v636_v7 }
 0x209   :  { %640 = vst.msk [vmem:[#allocation2] sm:$0xff] %vm61_vm0, %v638_v8 }
 0x20a   :  { %651 = dma.vmem_to_hbm [thread:$0]  %s647_s29, 128, %s649_s12, [#allocation3]  }
 0x20b   :  { %814 = dma.done.wait [#allocation3], 128  }
 0x20c   :  { %815 = vsyncadd [#allocation3], 4294967168 }
 0x20d   :  { %656 = vsyncpa [#allocation3], 1 }

</bundles_post_ra>
